<compile_context>
chip_gen: v7x
topology: tpu7x:2x2x1
jax: 0.10.0
libtpu: 0.0.40
codegen_flags: <defaults>
</compile_context>

<pallas_src>
import functools

import jax
import jax.numpy as jnp
from jax.experimental import pallas as pl
from jax.experimental.pallas import tpu as pltpu


def _style_kernel(x_ref, pmu_ref, psig_ref, o_ref, *, eps):
    # x_ref block: (Bt, C, HW); pmu/psig blocks: (C, P) channel-sublane.
    bt, c, hw = x_ref.shape
    inv_n = 1.0 / hw
    inv_nm1 = 1.0 / max(hw - 1, 1)      # torch.var default is unbiased (/(N-1))
    inv_c = 1.0 / c

    x = x_ref[...].astype(jnp.float32)                       # (Bt, C, HW)

    # Per-channel spatial statistics (reductions over the lane axis).
    mu = jnp.sum(x, axis=2, keepdims=True) * inv_n            # (Bt, C, 1)
    diff = x - mu
    var = jnp.sum(diff * diff, axis=2, keepdims=True) * inv_nm1
    sig = jnp.sqrt(var + eps)                                 # (Bt, C, 1)
    inv_sig = pl.reciprocal(sig)                              # exact 1/sig

    # abs_distance, then mean over channels (channel_wise=False).  All small
    # tensors keep C on sublanes, P on lanes -> no relayouts.
    pmu = pmu_ref[...].astype(jnp.float32)                    # (C, P)
    psig = psig_ref[...].astype(jnp.float32)                  # (C, P)
    ratio_proto = pmu / psig                                  # (C, P)
    ratio_cur = mu * inv_sig                                  # (Bt, C, 1)
    dist = jnp.sum(jnp.abs(ratio_cur - ratio_proto[None]),
                   axis=1, keepdims=True) * inv_c             # (Bt, 1, P)

    # alpha = softmax(1/(1+distance)) over prototypes.
    # 1/(1+d) is in (0, 1] so max-subtraction is unnecessary.
    e = jnp.exp(1.0 / (1.0 + dist))                           # (Bt, 1, P)
    alpha = e / jnp.sum(e, axis=2, keepdims=True)             # (Bt, 1, P)

    # Mixed prototype statistics, directly in channel-sublane layout
    # (tiny (Bt,C,P) contraction on the VPU; no MXU setup for P=2).
    mixed_mu = jnp.sum(alpha * pmu[None], axis=2, keepdims=True)   # (Bt, C, 1)
    mixed_sig = jnp.sum(alpha * psig[None], axis=2, keepdims=True)  # (Bt, C, 1)

    # out = (x - mu)/sig * mixed_sig + mixed_mu  ==  diff * scale + mixed_mu.
    scale = mixed_sig * inv_sig                               # (Bt, C, 1)
    o_ref[...] = (diff * scale + mixed_mu).astype(o_ref.dtype)


def _pick_batch_tile(B, C, HW, itemsize):
    """Largest batch tile whose double-buffered in+out blocks plus f32
    temporaries fit a conservative VMEM budget, keeping >=2 grid steps when
    possible (feed both v7x TensorCores / keep the pipeline busy)."""
    # 2x double-buffered input + 2x double-buffered output (native dtype)
    # + ~3 f32 in-kernel temporaries (x, diff, result) per batch slice.
    per_batch = C * HW * (4 * itemsize + 3 * 4)
    budget = 10 * 1024 * 1024            # safe under scoped-VMEM defaults
    bt = max(1, min(B, budget // per_batch))
    if bt >= B and B > 1:
        bt = (B + 1) // 2                # keep >= 2 grid steps
    while B % bt:                        # bt must divide B
        bt -= 1
    return bt


def style_representation_forward(fea, style_mu, style_sig, *, eps=1e-6):
    """fea: (B, C, H, W) NCHW.  style_mu/style_sig: (P, C)."""
    B, C, H, W = fea.shape
    P = style_mu.shape[0]
    HW = H * W

    x = fea.reshape(B, C, HW)
    # Channel-sublane layout for the prototypes: a free wrapper-side transpose
    # of P*C elements removes every in-kernel relayout.
    pmu_t = jnp.asarray(style_mu, jnp.float32).T     # (C, P)
    psig_t = jnp.asarray(style_sig, jnp.float32).T   # (C, P)

    bt = _pick_batch_tile(B, C, HW, jnp.dtype(fea.dtype).itemsize)

    out = pl.pallas_call(
        functools.partial(_style_kernel, eps=eps),
        out_shape=jax.ShapeDtypeStruct((B, C, HW), fea.dtype),
        grid=(B // bt,),
        in_specs=[
            pl.BlockSpec((bt, C, HW), lambda g: (g, 0, 0)),
            pl.BlockSpec((C, P), lambda g: (0, 0)),
            pl.BlockSpec((C, P), lambda g: (0, 0)),
        ],
        out_specs=pl.BlockSpec((bt, C, HW), lambda g: (g, 0, 0)),
        compiler_params=pltpu.CompilerParams(
            dimension_semantics=("parallel",)),
    )(x, pmu_t, psig_t)
    return out.reshape(B, C, H, W)


def _reference_forward(fea, style_mu, style_sig, eps=1e-6):
    """Pure-JAX reference mirroring the PyTorch module (eval mode)."""
    mu = fea.mean(axis=(2, 3))
    var = fea.var(axis=(2, 3), ddof=1)
    sig = jnp.sqrt(var + eps)
    dist = jnp.abs((mu / sig)[:, None, :]
                   - (style_mu / style_sig)[None, :, :]).mean(axis=2)
    alpha = jax.nn.softmax(1.0 / (1.0 + dist), axis=1)
    mixed_mu = alpha @ style_mu
    mixed_sig = alpha @ style_sig
    return ((fea - mu[:, :, None, None]) / sig[:, :, None, None]
            * mixed_sig[:, :, None, None] + mixed_mu[:, :, None, None])


if __name__ == "__main__":
    # Small shapes consistent with the module defaults
    # (num_prototype=2, channel_size=64, batch_size=4).
    B, C, H, W = 4, 64, 16, 16
    P = 2

    key = jax.random.PRNGKey(0)
    k_fea, k_mu = jax.random.split(key)

    fea = jax.random.normal(k_fea, (B, C, H, W), dtype=jnp.float32)

    # Deterministic parameter init matching __init__:
    # style_mu ~ trunc_normal(std=0.02, clipped at +/-2 std), style_sig = ones.
    style_mu = 0.02 * jax.random.truncated_normal(k_mu, -2.0, 2.0, (P, C),
                                                  dtype=jnp.float32)
    style_sig = jnp.ones((P, C), dtype=jnp.float32)

    out = style_representation_forward(fea, style_mu, style_sig)
    out = jax.block_until_ready(out)

    ref = _reference_forward(fea, style_mu, style_sig)
    assert out.shape == (B, C, H, W)
    assert jnp.allclose(out, ref, rtol=1e-4, atol=1e-4), "mismatch vs reference"

    print("KERNEL_OK")
</pallas_src>

<mosaic_0001>
module attributes {stable_mosaic.version = 11 : i64} {
  func.func @_style_kernel(%arg0: i32, %arg1: memref<2x64x256xf32, #tpu.memory_space<vmem>>, %arg2: memref<64x2xf32, #tpu.memory_space<vmem>>, %arg3: memref<64x2xf32, #tpu.memory_space<vmem>>, %arg4: memref<2x64x256xf32, #tpu.memory_space<vmem>>) attributes {dimension_semantics = [#tpu.dimension_semantics<parallel>], iteration_bounds = array<i64: 2>, scalar_prefetch = 0 : i64, scratch_operands = 0 : i64, tpu.core_type = #tpu.core_type<tc>, window_params = [{transform_indices = @transform_0, window_bounds = array<i64: 2, 64, 256>}, {pipeline_mode = #tpu.pipeline_mode<synchronous>, transform_indices = @transform_1, window_bounds = array<i64: 64, 2>}, {pipeline_mode = #tpu.pipeline_mode<synchronous>, transform_indices = @transform_2, window_bounds = array<i64: 64, 2>}, {transform_indices = @transform_3, window_bounds = array<i64: 2, 64, 256>}]} {
    %c0 = arith.constant 0 : index
    %c0_0 = arith.constant 0 : index
    %c0_1 = arith.constant 0 : index
    %0 = vector.load %arg1[%c0, %c0_0, %c0_1] : memref<2x64x256xf32, #tpu.memory_space<vmem>>, vector<2x64x256xf32>
    %cst = arith.constant dense<0.000000e+00> : vector<2x64xf32>
    %1 = vector.multi_reduction <add>, %0, %cst [2] : vector<2x64x256xf32> to vector<2x64xf32>
    %2 = vector.shape_cast %1 : vector<2x64xf32> to vector<2x64x1xf32>
    %cst_2 = arith.constant 3.906250e-03 : f32
    %3 = vector.broadcast %cst_2 : f32 to vector<2x64x1xf32>
    %4 = arith.mulf %2, %3 : vector<2x64x1xf32>
    %5 = vector.broadcast %4 : vector<2x64x1xf32> to vector<2x64x256xf32>
    %6 = arith.subf %0, %5 : vector<2x64x256xf32>
    %7 = arith.mulf %6, %6 : vector<2x64x256xf32>
    %cst_3 = arith.constant dense<0.000000e+00> : vector<2x64xf32>
    %8 = vector.multi_reduction <add>, %7, %cst_3 [2] : vector<2x64x256xf32> to vector<2x64xf32>
    %9 = vector.shape_cast %8 : vector<2x64xf32> to vector<2x64x1xf32>
    %cst_4 = arith.constant 0.00392156886 : f32
    %10 = vector.broadcast %cst_4 : f32 to vector<2x64x1xf32>
    %11 = arith.mulf %9, %10 : vector<2x64x1xf32>
    %cst_5 = arith.constant 9.99999997E-7 : f32
    %12 = vector.broadcast %cst_5 : f32 to vector<2x64x1xf32>
    %13 = arith.addf %11, %12 : vector<2x64x1xf32>
    %14 = math.sqrt %13 : vector<2x64x1xf32>
    %15 = tpu.reciprocal %14 : vector<2x64x1xf32> -> vector<2x64x1xf32>
    %c0_6 = arith.constant 0 : index
    %c0_7 = arith.constant 0 : index
    %16 = vector.load %arg2[%c0_6, %c0_7] : memref<64x2xf32, #tpu.memory_space<vmem>>, vector<64x2xf32>
    %c0_8 = arith.constant 0 : index
    %c0_9 = arith.constant 0 : index
    %17 = vector.load %arg3[%c0_8, %c0_9] : memref<64x2xf32, #tpu.memory_space<vmem>>, vector<64x2xf32>
    %18 = arith.divf %16, %17 : vector<64x2xf32>
    %19 = arith.mulf %4, %15 : vector<2x64x1xf32>
    %20 = vector.shape_cast %18 : vector<64x2xf32> to vector<1x64x2xf32>
    %21 = vector.broadcast %19 : vector<2x64x1xf32> to vector<2x64x2xf32>
    %22 = vector.broadcast %20 : vector<1x64x2xf32> to vector<2x64x2xf32>
    %23 = arith.subf %21, %22 : vector<2x64x2xf32>
    %24 = math.absf %23 : vector<2x64x2xf32>
    %cst_10 = arith.constant dense<0.000000e+00> : vector<2x2xf32>
    %25 = vector.multi_reduction <add>, %24, %cst_10 [1] : vector<2x64x2xf32> to vector<2x2xf32>
    %26 = vector.shape_cast %25 : vector<2x2xf32> to vector<2x1x2xf32>
    %cst_11 = arith.constant 1.562500e-02 : f32
    %27 = vector.broadcast %cst_11 : f32 to vector<2x1x2xf32>
    %28 = arith.mulf %26, %27 : vector<2x1x2xf32>
    %cst_12 = arith.constant 1.000000e+00 : f32
    %29 = vector.broadcast %cst_12 : f32 to vector<2x1x2xf32>
    %30 = arith.addf %29, %28 : vector<2x1x2xf32>
    %cst_13 = arith.constant 1.000000e+00 : f32
    %31 = vector.broadcast %cst_13 : f32 to vector<2x1x2xf32>
    %32 = arith.divf %31, %30 : vector<2x1x2xf32>
    %33 = math.exp %32 : vector<2x1x2xf32>
    %cst_14 = arith.constant dense<0.000000e+00> : vector<2x1xf32>
    %34 = vector.multi_reduction <add>, %33, %cst_14 [2] : vector<2x1x2xf32> to vector<2x1xf32>
    %35 = vector.shape_cast %34 : vector<2x1xf32> to vector<2x1x1xf32>
    %36 = vector.broadcast %35 : vector<2x1x1xf32> to vector<2x1x2xf32>
    %37 = arith.divf %33, %36 : vector<2x1x2xf32>
    %38 = vector.shape_cast %16 : vector<64x2xf32> to vector<1x64x2xf32>
    %39 = vector.broadcast %37 : vector<2x1x2xf32> to vector<2x64x2xf32>
    %40 = vector.broadcast %38 : vector<1x64x2xf32> to vector<2x64x2xf32>
    %41 = arith.mulf %39, %40 : vector<2x64x2xf32>
    %cst_15 = arith.constant dense<0.000000e+00> : vector<2x64xf32>
    %42 = vector.multi_reduction <add>, %41, %cst_15 [2] : vector<2x64x2xf32> to vector<2x64xf32>
    %43 = vector.shape_cast %42 : vector<2x64xf32> to vector<2x64x1xf32>
    %44 = vector.shape_cast %17 : vector<64x2xf32> to vector<1x64x2xf32>
    %45 = vector.broadcast %37 : vector<2x1x2xf32> to vector<2x64x2xf32>
    %46 = vector.broadcast %44 : vector<1x64x2xf32> to vector<2x64x2xf32>
    %47 = arith.mulf %45, %46 : vector<2x64x2xf32>
    %cst_16 = arith.constant dense<0.000000e+00> : vector<2x64xf32>
    %48 = vector.multi_reduction <add>, %47, %cst_16 [2] : vector<2x64x2xf32> to vector<2x64xf32>
    %49 = vector.shape_cast %48 : vector<2x64xf32> to vector<2x64x1xf32>
    %50 = arith.mulf %49, %15 : vector<2x64x1xf32>
    %51 = vector.broadcast %50 : vector<2x64x1xf32> to vector<2x64x256xf32>
    %52 = arith.mulf %6, %51 : vector<2x64x256xf32>
    %53 = vector.broadcast %43 : vector<2x64x1xf32> to vector<2x64x256xf32>
    %54 = arith.addf %52, %53 : vector<2x64x256xf32>
    %c0_17 = arith.constant 0 : index
    %c0_18 = arith.constant 0 : index
    %c0_19 = arith.constant 0 : index
    %55 = vector.load %arg4[%c0_17, %c0_18, %c0_19] : memref<2x64x256xf32, #tpu.memory_space<vmem>>, vector<2x64x256xf32>
    tpu.vector_store %arg4[%c0_17, %c0_18, %c0_19], %54 {strides = array<i32>} : memref<2x64x256xf32, #tpu.memory_space<vmem>>, vector<2x64x256xf32>,
    return
  }
  func.func @transform_0(%arg0: i32) -> (i32, i32, i32) {
    %c0_i32 = arith.constant 0 : i32
    %c0_i32_0 = arith.constant 0 : i32
    %c0_i32_1 = arith.constant 0 : i32
    return %arg0, %c0_i32, %c0_i32_0 : i32, i32, i32
  }
  func.func @transform_1(%arg0: i32) -> (i32, i32) {
    %c0_i32 = arith.constant 0 : i32
    %c0_i32_0 = arith.constant 0 : i32
    %c0_i32_1 = arith.constant 0 : i32
    return %c0_i32, %c0_i32_0 : i32, i32
  }
  func.func @transform_2(%arg0: i32) -> (i32, i32) {
    %c0_i32 = arith.constant 0 : i32
    %c0_i32_0 = arith.constant 0 : i32
    %c0_i32_1 = arith.constant 0 : i32
    return %c0_i32, %c0_i32_0 : i32, i32
  }
  func.func @transform_3(%arg0: i32) -> (i32, i32, i32) {
    %c0_i32 = arith.constant 0 : i32
    %c0_i32_0 = arith.constant 0 : i32
    %c0_i32_1 = arith.constant 0 : i32
    return %arg0, %c0_i32, %c0_i32_0 : i32, i32, i32
  }
}

</mosaic_0001>

<bundles_post_ra>
// kernel: tpu_custom_call.1
= control target key start
LH: loop header
LB: loop body
LE: loop exit
PB: predicated region body
PF: predicated region fallthrough
CT: control target
= control target key end

     0   :  { %8 = vsyncpa [#allocation3], 0  ;;  %s2440_s0 = inlined_call_operand.hbm [shape: f32[4,64,256], index: 0, kind: input, shape index: {}]   ;;  %s2441_s1 = inlined_call_operand.vmem [shape: f32[64,2], index: 1, kind: input, shape index: {}]   ;;  %s2442_s2 = inlined_call_operand.vmem [shape: f32[64,2], index: 2, kind: input, shape index: {}]   ;;  %s2443_s3 = inlined_call_operand.hbm [shape: f32[4,64,256], index: 3, kind: output, shape index: {}]  }
   0x1   :  { %10 = vsyncpa [#allocation3 + $0x1], 0 }
   0x2   :  { %11 = vsyncpa [#allocation4], 0 }
   0x3   :  { %13 = vsyncpa [#allocation4 + $0x1], 0  ;;  %s1319_s12 = smov 0   ;;  %s1321_s13 = smov 0  }
   0x4   :  { %s1323_s14 = smov 0   ;;  %s1325_s15 = smov 0  }
   0x5 LB: > { %s1340_s16 = sadd.s32 4294967295, %s1291_s15   ;;  %s1033_s17 = sadd.s32 4294967294, %s1291_s15   ;;  %s1291_s15 = sphi %s1325_s15, %s2552_s15   ;;  %s1287_s14 = sphi %s1323_s14, %s2551_s14   ;;  %s1283_s13 = sphi %s1321_s13, %s2550_s13   ;;  %s1279_s12 = sphi %s1319_s12, %s2549_s12  }
   0x6   : > { %s1344_s18 = sadd.s32 1, %s1291_s15   ;;  %s26_s19 = sadd.s32 1, %s1287_s14 }
   0x7   : > { %s23_s20 = ssub.s32 %s1291_s15, %s1344_s18  ;;  %p33_p0 = scmp.ne.s32.totalorder %s1287_s14, %s1283_s13 }
   0x8   : > { %p24_p1 = scmp.eq.s32.totalorder %s23_s20, 0  ;;  %p34_p2 = scmp.eq.s32.totalorder %s1291_s15, 0 }
   0x9   : > { %p39_p3 = scmp.ne.s32.totalorder %s1283_s13, %s1279_s12  ;;  %p40_p4 = scmp.eq.s32.totalorder %s1340_s16, 0 }
   0xa   : > { %s1356_s21 = scalar_select %p24_p1, %s1287_s14, %s26_s19  }
   0xb   : > { %p1358_p5 = por %p34_p2, %p33_p0  ;;  %p1362_p6 = por %p40_p4, %p39_p3 }
   0xc   : > { %p105_p7 = scmp.eq.s32.totalorder %s1340_s16, 1  ;;  %p111_p8 = scmp.eq.s32.totalorder %s1033_s17, 1 }
   0xd   : > { %p1065_p10 = scmp.lt.s32.totalorder %s1291_s15, 2  ;;  %s137_s26 = sand.u32 1, %s1287_s14  }
   0xe   : > { %p1369_p11 = por %p105_p7, %p33_p0  ;;  %p1373_p12 = por %p111_p8, %p39_p3 }
   0xf   : > { %s1050_s27 = sshll.u32 %s1291_s15, 12  ;;  %s1036_s28 = sshll.u32 %s137_s26, 8 }
  0x10   : > { %s2479_s24 = scalar_select %p1369_p11, 1, 0 }
  0x11   : > { %s2480_s25 = scalar_select %p1373_p12, 1, 0 }
  0x12   : > { %s1382_s4 = scalar_lea.hbm %s2440_s0, %s1050_s27  ;;  %s141_s5 = scalar_lea.vmem [#allocation2], %s1036_s28 }
  0x13   : > { %s149_s6 = sshll.u32 %s141_s5, 4  ;;  %p1386_p13 = pnand %p1065_p10, %p1358_p5  ;;  %s1390_s6 = int_to_ptr.vmem [resolvable:$true] %s149_s6 }
  0x14   : > { %s1392_s8 = scalar_lea.sflag [#allocation3], %s137_s26  ;;  %s1195_s9 = scalar_lea.hbm %s1382_s4, 4096 }
  0x15   : > { %p1196_p0 = scmp.ne.s32.totalorder %s1382_s4, %s1195_s9  ;;  %p1197_p1 = pneg %p1386_p13 }
  0x16   : > { %s1200_s17 = scalar_lea.hbm %s2440_s0, 8192  ;;  %p1201_p4 = scmp.lt.u32.totalorder %s1382_s4, %s2440_s0 }
  0x17   : > { %p1198_p2 = pnand %p1197_p1, %p1196_p0  ;;  %p1202_p5 = scmp.lt.u32.totalorder %s1200_s17, %s1195_s9 }
  0x18   : > { %p1204_p8 = scmp.lt.u32.totalorder %s1195_s9, %s1382_s4 }
  0x19   : > { %p1199_p3 = pneg %p1198_p2  ;;  %p1203_p7 = por %p1202_p5, %p1201_p4 }
  0x1b   : > { %p1205_p10 = por %p1204_p8, %p1203_p7 }
  0x1d   : > { %p1206_p9 = pnand %p1205_p10, %p1199_p3 }
  0x1f   : > { %1209 = shalt.err (!%p1206_p9)
}
  0x20   : > { %s1210_s22 = scalar_lea.vmem %s1390_s6, 4096  ;;  %s1293_s26 = smov [#allocation2]  }
  0x21   : > { %p1211_p0 = scmp.ne.s32.totalorder %s1390_s6, %s1210_s22  ;;  %s1215_s27 = sshll.u32 %s1293_s26, 4  ;;  %s1216_s27 = int_to_ptr.vmem [resolvable:$false] %s1215_s27 }
  0x22   : > { %s1217_s28 = scalar_lea.vmem %s1216_s27, 8192  ;;  %p1218_p11 = scmp.lt.s32.totalorder %s1390_s6, %s1216_s27 }
  0x23   : > { %p1213_p2 = pnand %p1211_p0, %p1197_p1  ;;  %p1219_p4 = scmp.lt.s32.totalorder %s1217_s28, %s1210_s22 }
  0x25   : > { %p1214_p12 = pneg %p1213_p2  ;;  %p1220_p5 = por %p1219_p4, %p1218_p11 }
  0x27   : > { %p1221_p7 = pnand %p1220_p5, %p1214_p12 }
  0x29   : > { %1224 = shalt.err (!%p1221_p7)
}
  0x2a   : > { %s1294_s29 = smov 256   ;;  %s1295_s30 = smov 16  }
  0x2b   : > { %1060 = dma.hbm_to_vmem [thread:$0]  (!%p1386_p13), %s1382_s4, 4096, %s1390_s6, %s1392_s8, %s1294_s29, %s1294_s29, %s1295_s30  }
  0x2c   : > { %p1040_p9 = scmp.ge.s32.totalorder %s1291_s15, 1  ;;  %p157_p1 = scmp.lt.s32.totalorder %s1291_s15, 3 }
  0x2e   : > { %p158_p3 = pnand %p1040_p9, %p157_p1 }
  0x30   : > { %161 = sbr.rel (%p158_p3) target bundleno = 848 (0x350), region = 32 }
  0x37   : > { %s1423_s5 = sand.u32 1, %s1283_s13  }
  0x38   : > { %s1041_s9 = sshll.u32 %s1423_s5, 8  ;;  %s164_s10 = scalar_lea.sflag [#allocation3], %s1423_s5 }
  0x39   : > { %s1429_s11 = scalar_lea.vmem [#allocation2], %s1041_s9 }
  0x3a   : > { %1270 = dma.done.wait (%p1362_p6), %s164_s10, 4096  }
  0x3b   : > { %1272 = vsyncadd (%p1362_p6), %s164_s10, 4294963200  ;;  %v1436_v0 = vld [vmem:[%s1429_s11] sm:$0xff]  ;;  %v1439_v1 = vld [vmem:[%s1429_s11 + $0x8] sm:$0xff]  ;;  %s2315_s23 = scalar_lea.vmem [#allocation5], %s1041_s9  ;;  %s1052_s9 = sshll.u32 %s1340_s16, 12 }
  0x3c   : > { %v1442_v2 = vld [vmem:[%s1429_s11 + $0x80] sm:$0xff]  ;;  %v224_v3 = vadd.f32 %v1439_v1, %v1436_v0  ;;  %v1447_v4 = vld [vmem:[%s1429_s11 + $0x88] sm:$0xff]  ;;  %v1450_v5 = vld [vmem:[%s1429_s11 + $0x10] sm:$0xff]  ;;  %s960_s4 = sshll.u32 %s2315_s23, 4  ;;  %s2390_s7 = scalar_lea.hbm %s2443_s3, %s1052_s9  ;;  %s2392_s4 = int_to_ptr.vmem [resolvable:$true] %s960_s4 }
  0x3d   : > { %v1453_v6 = vld [vmem:[%s1429_s11 + $0x18] sm:$0xff]  ;;  %v248_v7 = vadd.f32 %v1447_v4, %v1442_v2  ;;  %v1458_v8 = vld [vmem:[%s1429_s11 + $0x90] sm:$0xff]  ;;  %v1468_v12 = vld [vmem:[%s1429_s11 + $0x20] sm:$0xff]  ;;  %s946_s8 = scalar_lea.sflag [#allocation4], %s1423_s5  ;;  %s1225_s17 = scalar_lea.vmem %s2392_s4, 4096 }
  0x3e   : > { %v1461_v9 = vld [vmem:[%s1429_s11 + $0x98] sm:$0xff]  ;;  %225 = vadd.xlane.f32.xlu0 %v224_v3  ;;  %v227_v10 = vadd.f32 %v1453_v6, %v1450_v5  ;;  %v1471_v13 = vld [vmem:[%s1429_s11 + $0x28] sm:$0xff]  ;;  %v1474_v14 = vld [vmem:[%s1429_s11 + $0xa0] sm:$0xff]  ;;  %p1226_p6 = scmp.ne.s32.totalorder %s2392_s4, %s1225_s17  ;;  %p2546_p11 = scmp.ne.s32.totalorder %s2479_s24, 0 }
  0x3f   : > { %249 = vadd.xlane.f32.xlu1 %v248_v7  ;;  %v251_v11 = vadd.f32 %v1461_v9, %v1458_v8  ;;  %v1477_v15 = vld [vmem:[%s1429_s11 + $0xa8] sm:$0xff]  ;;  %v230_v16 = vadd.f32 %v1471_v13, %v1468_v12  ;;  %v1484_v18 = vld [vmem:[%s1429_s11 + $0x30] sm:$0xff]  ;;  %v1487_v19 = vld [vmem:[%s1429_s11 + $0x38] sm:$0xff]  ;;  %s1296_s19 = smov [#allocation5]  }
  0x40   : > { %v254_v17 = vadd.f32 %v1477_v15, %v1474_v14  ;;  %v1490_v20 = vld [vmem:[%s1429_s11 + $0xb0] sm:$0xff]  ;;  %v1493_v21 = vld [vmem:[%s1429_s11 + $0xb8] sm:$0xff]  ;;  %v233_v22 = vadd.f32 %v1487_v19, %v1484_v18  ;;  %v1500_v24 = vld [vmem:[%s1429_s11 + $0x40] sm:$0xff]  ;;  %p1227_p12 = pnand %p1226_p6, %p2546_p11  ;;  %s1229_s20 = sshll.u32 %s1296_s19, 4  ;;  %s1230_s20 = int_to_ptr.vmem [resolvable:$false] %s1229_s20 }
  0x41   : > { %v257_v23 = vadd.f32 %v1493_v21, %v1490_v20  ;;  %v1503_v25 = vld [vmem:[%s1429_s11 + $0x48] sm:$0xff]  ;;  %v1506_v26 = vld [vmem:[%s1429_s11 + $0xc0] sm:$0xff]  ;;  %v1516_v30 = vld [vmem:[%s1429_s11 + $0x50] sm:$0xff]  ;;  %s1231_s22 = scalar_lea.vmem %s1230_s20, 8192  ;;  %p1232_p8 = scmp.lt.s32.totalorder %s2392_s4, %s1230_s20 }
  0x42   : > { %228 = vadd.xlane.f32.xlu0 %v227_v10  ;;  %v1509_v27 = vld [vmem:[%s1429_s11 + $0xc8] sm:$0xff]  ;;  %v236_v28 = vadd.f32 %v1503_v25, %v1500_v24  ;;  %v1519_v31 = vld [vmem:[%s1429_s11 + $0x58] sm:$0xff]  ;;  %v1522_v32 = vld [vmem:[%s1429_s11 + $0xd0] sm:$0xff]  ;;  %p1228_p13 = pneg %p1227_p12  ;;  %p1233_p10 = scmp.lt.s32.totalorder %s1231_s22, %s1225_s17 }
  0x43   : > { %252 = vadd.xlane.f32.xlu1 %v251_v11  ;;  %v260_v29 = vadd.f32 %v1509_v27, %v1506_v26  ;;  %v1525_v33 = vld [vmem:[%s1429_s11 + $0xd8] sm:$0xff]  ;;  %v239_v34 = vadd.f32 %v1519_v31, %v1516_v30  ;;  %v1532_v36 = vld [vmem:[%s1429_s11 + $0x60] sm:$0xff]  ;;  %v1535_v37 = vld [vmem:[%s1429_s11 + $0x68] sm:$0xff] }
  0x44   : > { %v263_v35 = vadd.f32 %v1525_v33, %v1522_v32  ;;  %v1538_v38 = vld [vmem:[%s1429_s11 + $0xe0] sm:$0xff]  ;;  %v1541_v39 = vld [vmem:[%s1429_s11 + $0xe8] sm:$0xff]  ;;  %v242_v40 = vadd.f32 %v1535_v37, %v1532_v36  ;;  %v1548_v42 = vld [vmem:[%s1429_s11 + $0x70] sm:$0xff]  ;;  %p1234_p0 = por %p1233_p10, %p1232_p8 }
  0x45   : > { %v266_v41 = vadd.f32 %v1541_v39, %v1538_v38  ;;  %v1551_v43 = vld [vmem:[%s1429_s11 + $0x78] sm:$0xff]  ;;  %v1554_v44 = vld [vmem:[%s1429_s11 + $0xf0] sm:$0xff] }
  0x46   : > { %231 = vadd.xlane.f32.xlu0 %v230_v16  ;;  %v1557_v45 = vld [vmem:[%s1429_s11 + $0xf8] sm:$0xff]  ;;  %v245_v46 = vadd.f32 %v1551_v43, %v1548_v42  ;;  %p1235_p2 = pnand %p1234_p0, %p1228_p13 }
  0x47   : > { %255 = vadd.xlane.f32.xlu1 %v254_v17  ;;  %v269_v47 = vadd.f32 %v1557_v45, %v1554_v44 }
  0x4a   : > { %234 = vadd.xlane.f32.xlu0 %v233_v22 }
  0x4b   : > { %258 = vadd.xlane.f32.xlu1 %v257_v23 }
  0x4e   : > { %237 = vadd.xlane.f32.xlu0 %v236_v28 }
  0x4f   : > { %261 = vadd.xlane.f32.xlu1 %v260_v29 }
  0x52   : > { %240 = vadd.xlane.f32.xlu0 %v239_v34 }
  0x53   : > { %264 = vadd.xlane.f32.xlu1 %v263_v35 }
  0x56   : > { %243 = vadd.xlane.f32.xlu0 %v242_v40 }
  0x57   : > { %267 = vadd.xlane.f32.xlu1 %v266_v41 }
  0x5a   : > { %246 = vadd.xlane.f32.xlu0 %v245_v46 }
  0x5b   : > { %270 = vadd.xlane.f32.xlu1 %v269_v47 }
  0xcb   : > { %v226_v48 = vpop.xlane.xlu0 %225 }
  0xcc   : > { %v1563_v49 = vmul.f32 0.00390625, %v226_v48  ;;  %v250_v50 = vpop.xlane.xlu1 %249 }
  0xcd   : > { %v1565_v51 = vmul.f32 0.00390625, %v250_v50 }
  0xce   : > { %v1569_v52 = vsub.f32 %v1436_v0, %v1563_v49  ;;  %v1573_v53 = vsub.f32 %v1439_v1, %v1563_v49 }
  0xcf   : > { %v1577_v54 = vsub.f32 %v1442_v2, %v1565_v51  ;;  %v1581_v55 = vsub.f32 %v1447_v4, %v1565_v51  ;;  %v229_v56 = vpop.xlane.xlu0 %228 }
  0xd0   : > { %2482 = vst [vmem:[#allocation8_spill] sm:$0xff] %v1569_v52  ;;  %2483 = vst [vmem:[#allocation9_spill] sm:$0xff] %v1573_v53  ;;  %v1583_v57 = vmul.f32 0.00390625, %v229_v56  ;;  %v253_v58 = vpop.xlane.xlu1 %252  ;;  %v320_v59 = vmul.f32 %v1569_v52, %v1569_v52  ;;  %v321_v60 = vmul.f32 %v1573_v53, %v1573_v53 }
  0xd1   : > { %2484 = vst [vmem:[#allocation10_spill] sm:$0xff] %v1577_v54  ;;  %2485 = vst [vmem:[#allocation11_spill] sm:$0xff] %v1581_v55  ;;  %v1589_v61 = vmul.f32 0.00390625, %v253_v58  ;;  %v336_v62 = vmul.f32 %v1577_v54, %v1577_v54  ;;  %v337_v63 = vmul.f32 %v1581_v55, %v1581_v55 }
  0xd2   : > { %v1597_v0 = vsub.f32 %v1450_v5, %v1583_v57  ;;  %v1601_v1 = vsub.f32 %v1453_v6, %v1583_v57  ;;  %v352_v2 = vadd.f32 %v321_v60, %v320_v59 }
  0xd3   : > { %v1605_v3 = vsub.f32 %v1458_v8, %v1589_v61  ;;  %v1609_v4 = vsub.f32 %v1461_v9, %v1589_v61  ;;  %v232_v7 = vpop.xlane.xlu0 %231  ;;  %v376_v5 = vadd.f32 %v337_v63, %v336_v62 }
  0xd4   : > { %2486 = vst [vmem:[#allocation12_spill] sm:$0xff] %v1597_v0  ;;  %2487 = vst [vmem:[#allocation13_spill] sm:$0xff] %v1601_v1  ;;  %v1611_v10 = vmul.f32 0.00390625, %v232_v7  ;;  %353 = vadd.xlane.f32.xlu0 %v352_v2  ;;  %v256_v11 = vpop.xlane.xlu1 %255  ;;  %v322_v16 = vmul.f32 %v1597_v0, %v1597_v0  ;;  %v323_v6 = vmul.f32 %v1601_v1, %v1601_v1 }
  0xd5   : > { %2488 = vst [vmem:[#allocation14_spill] sm:$0xff] %v1605_v3  ;;  %2489 = vst [vmem:[#allocation15_spill] sm:$0xff] %v1609_v4  ;;  %v1617_v17 = vmul.f32 0.00390625, %v256_v11  ;;  %v338_v8 = vmul.f32 %v1605_v3, %v1605_v3  ;;  %v339_v9 = vmul.f32 %v1609_v4, %v1609_v4 }
  0xd6   : > { %v1625_v22 = vsub.f32 %v1468_v12, %v1611_v10  ;;  %v1629_v23 = vsub.f32 %v1471_v13, %v1611_v10  ;;  %v355_v28 = vadd.f32 %v323_v6, %v322_v16 }
  0xd7   : > { %v1633_v29 = vsub.f32 %v1474_v14, %v1617_v17  ;;  %v1637_v34 = vsub.f32 %v1477_v15, %v1617_v17  ;;  %v235_v35 = vpop.xlane.xlu0 %234  ;;  %v379_v41 = vadd.f32 %v339_v9, %v338_v8 }
  0xd8   : > { %2490 = vst [vmem:[#allocation16_spill] sm:$0xff] %v1625_v22  ;;  %2491 = vst [vmem:[#allocation17_spill] sm:$0xff] %v1629_v23  ;;  %v1639_v40 = vmul.f32 0.00390625, %v235_v35  ;;  %377 = vadd.xlane.f32.xlu0 %v376_v5  ;;  %356 = vadd.xlane.f32.xlu1 %v355_v28  ;;  %v259_v12 = vpop.xlane.xlu1 %258  ;;  %v324_v13 = vmul.f32 %v1625_v22, %v1625_v22  ;;  %v325_v46 = vmul.f32 %v1629_v23, %v1629_v23 }
  0xd9   : > { %2492 = vst [vmem:[#allocation18_spill] sm:$0xff] %v1633_v29  ;;  %2493 = vst [vmem:[#allocation19_spill] sm:$0xff] %v1637_v34  ;;  %v1645_v47 = vmul.f32 0.00390625, %v259_v12  ;;  %v340_v14 = vmul.f32 %v1633_v29, %v1633_v29  ;;  %v341_v15 = vmul.f32 %v1637_v34, %v1637_v34 }
  0xda   : > { %v1653_v48 = vsub.f32 %v1484_v18, %v1639_v40  ;;  %v1657_v50 = vsub.f32 %v1487_v19, %v1639_v40  ;;  %v358_v56 = vadd.f32 %v325_v46, %v324_v13 }
  0xdb   : > { %v1661_v58 = vsub.f32 %v1490_v20, %v1645_v47  ;;  %v1665_v59 = vsub.f32 %v1493_v21, %v1645_v47  ;;  %v238_v60 = vpop.xlane.xlu0 %237  ;;  %v382_v63 = vadd.f32 %v341_v15, %v340_v14 }
  0xdc   : > { %2494 = vst [vmem:[#allocation20_spill] sm:$0xff] %v1653_v48  ;;  %2495 = vst [vmem:[#allocation21_spill] sm:$0xff] %v1657_v50  ;;  %v1667_v62 = vmul.f32 0.00390625, %v238_v60  ;;  %380 = vadd.xlane.f32.xlu1 %v379_v41  ;;  %359 = vadd.xlane.f32.xlu0 %v358_v56  ;;  %v262_v18 = vpop.xlane.xlu1 %261  ;;  %v326_v19 = vmul.f32 %v1653_v48, %v1653_v48  ;;  %v327_v2 = vmul.f32 %v1657_v50, %v1657_v50 }
  0xdd   : > { %2496 = vst [vmem:[#allocation22_spill] sm:$0xff] %v1661_v58  ;;  %2497 = vst [vmem:[#allocation23_spill] sm:$0xff] %v1665_v59  ;;  %v1673_v7 = vmul.f32 0.00390625, %v262_v18  ;;  %v342_v20 = vmul.f32 %v1661_v58, %v1661_v58  ;;  %v343_v21 = vmul.f32 %v1665_v59, %v1665_v59 }
  0xde   : > { %v1681_v11 = vsub.f32 %v1500_v24, %v1667_v62  ;;  %v1685_v5 = vsub.f32 %v1503_v25, %v1667_v62  ;;  %v361_v16 = vadd.f32 %v327_v2, %v326_v19 }
  0xdf   : > { %v1689_v6 = vsub.f32 %v1506_v26, %v1673_v7  ;;  %v1693_v8 = vsub.f32 %v1509_v27, %v1673_v7  ;;  %v241_v9 = vpop.xlane.xlu0 %240  ;;  %v385_v35 = vadd.f32 %v343_v21, %v342_v20 }
  0xe0   : > { %2498 = vst [vmem:[#allocation24_spill] sm:$0xff] %v1681_v11  ;;  %2499 = vst [vmem:[#allocation25_spill] sm:$0xff] %v1685_v5  ;;  %v1695_v28 = vmul.f32 0.00390625, %v241_v9  ;;  %383 = vadd.xlane.f32.xlu1 %v382_v63  ;;  %362 = vadd.xlane.f32.xlu0 %v361_v16  ;;  %v265_v24 = vpop.xlane.xlu1 %264  ;;  %v328_v25 = vmul.f32 %v1681_v11, %v1681_v11  ;;  %v329_v12 = vmul.f32 %v1685_v5, %v1685_v5 }
  0xe1   : > { %2500 = vst [vmem:[#allocation26_spill] sm:$0xff] %v1689_v6  ;;  %2501 = vst [vmem:[#allocation27_spill] sm:$0xff] %v1693_v8  ;;  %v1701_v41 = vmul.f32 0.00390625, %v265_v24  ;;  %v344_v26 = vmul.f32 %v1689_v6, %v1689_v6  ;;  %v345_v27 = vmul.f32 %v1693_v8, %v1693_v8  ;;  %v1844_v8 = vld [vmem:[%s2442_s2 + $0x30] sm:$0xff] }
  0xe2   : > { %v1709_v13 = vsub.f32 %v1516_v30, %v1695_v28  ;;  %v1713_v46 = vsub.f32 %v1519_v31, %v1695_v28  ;;  %v364_v14 = vadd.f32 %v329_v12, %v328_v25 }
  0xe3   : > { %v1717_v15 = vsub.f32 %v1522_v32, %v1701_v41  ;;  %v1721_v56 = vsub.f32 %v1525_v33, %v1701_v41  ;;  %v244_v60 = vpop.xlane.xlu0 %243  ;;  %v388_v63 = vadd.f32 %v345_v27, %v344_v26 }
  0xe4   : > { %2502 = vst [vmem:[#allocation28_spill] sm:$0xff] %v1709_v13  ;;  %2503 = vst [vmem:[#allocation29_spill] sm:$0xff] %v1713_v46  ;;  %v1723_v18 = vmul.f32 0.00390625, %v244_v60  ;;  %386 = vadd.xlane.f32.xlu1 %v385_v35  ;;  %365 = vadd.xlane.f32.xlu0 %v364_v14  ;;  %v268_v30 = vpop.xlane.xlu1 %267  ;;  %v330_v31 = vmul.f32 %v1709_v13, %v1709_v13  ;;  %v331_v19 = vmul.f32 %v1713_v46, %v1713_v46 }
  0xe5   : > { %2504 = vst [vmem:[#allocation30_spill] sm:$0xff] %v1717_v15  ;;  %2505 = vst [vmem:[#allocation31_spill] sm:$0xff] %v1721_v56  ;;  %v1729_v2 = vmul.f32 0.00390625, %v268_v30  ;;  %v346_v32 = vmul.f32 %v1717_v15, %v1717_v15  ;;  %v347_v33 = vmul.f32 %v1721_v56, %v1721_v56 }
  0xe6   : > { %v1737_v20 = vsub.f32 %v1532_v36, %v1723_v18  ;;  %v1741_v21 = vsub.f32 %v1535_v37, %v1723_v18  ;;  %v367_v16 = vadd.f32 %v331_v19, %v330_v31 }
  0xe7   : > { %v1745_v9 = vsub.f32 %v1538_v38, %v1729_v2  ;;  %v1749_v24 = vsub.f32 %v1541_v39, %v1729_v2  ;;  %v247_v35 = vpop.xlane.xlu0 %246  ;;  %v391_v12 = vadd.f32 %v347_v33, %v346_v32 }
  0xe8   : > { %2506 = vst [vmem:[#allocation32_spill] sm:$0xff] %v1737_v20  ;;  %2507 = vst [vmem:[#allocation33_spill] sm:$0xff] %v1741_v21  ;;  %v1751_v25 = vmul.f32 0.00390625, %v247_v35  ;;  %389 = vadd.xlane.f32.xlu1 %v388_v63  ;;  %368 = vadd.xlane.f32.xlu0 %v367_v16  ;;  %v271_v36 = vpop.xlane.xlu1 %270  ;;  %v332_v37 = vmul.f32 %v1737_v20, %v1737_v20  ;;  %v333_v26 = vmul.f32 %v1741_v21, %v1741_v21 }
  0xe9   : > { %2508 = vst [vmem:[#allocation34_spill] sm:$0xff] %v1745_v9  ;;  %2509 = vst [vmem:[#allocation35_spill] sm:$0xff] %v1749_v24  ;;  %v1757_v27 = vmul.f32 0.00390625, %v271_v36  ;;  %v348_v38 = vmul.f32 %v1745_v9, %v1745_v9  ;;  %v349_v39 = vmul.f32 %v1749_v24, %v1749_v24 }
  0xea   : > { %v1765_v14 = vsub.f32 %v1548_v42, %v1751_v25  ;;  %v1769_v60 = vsub.f32 %v1551_v43, %v1751_v25  ;;  %v370_v30 = vadd.f32 %v333_v26, %v332_v37  ;;  %v1792_v26 = vld [vmem:[%s2442_s2] sm:$0xff] }
  0xeb   : > { %v1773_v63 = vsub.f32 %v1554_v44, %v1757_v27  ;;  %v1777_v31 = vsub.f32 %v1557_v45, %v1757_v27  ;;  %v394_v19 = vadd.f32 %v349_v39, %v348_v38  ;;  %v1797_v38 = vld [vmem:[%s2442_s2 + $0x8] sm:$0xff] }
  0xec   : > { %2510 = vst [vmem:[#allocation36_spill] sm:$0xff] %v1765_v14  ;;  %2511 = vst [vmem:[#allocation37_spill] sm:$0xff] %v1769_v60  ;;  %392 = vadd.xlane.f32.xlu1 %v391_v12  ;;  %371 = vadd.xlane.f32.xlu0 %v370_v30  ;;  %v334_v42 = vmul.f32 %v1765_v14, %v1765_v14  ;;  %v335_v32 = vmul.f32 %v1769_v60, %v1769_v60 }
  0xed   : > { %2512 = vst [vmem:[#allocation38_spill] sm:$0xff] %v1773_v63  ;;  %2513 = vst [vmem:[#allocation39_spill] sm:$0xff] %v1777_v31  ;;  %v350_v43 = vmul.f32 %v1773_v63, %v1773_v63  ;;  %v351_v44 = vmul.f32 %v1777_v31, %v1777_v31 }
  0xee   : > { %v373_v33 = vadd.f32 %v335_v32, %v334_v42 }
  0xef   : > { %v397_v45 = vadd.f32 %v351_v44, %v350_v43  ;;  %v1811_v44 = vld [vmem:[%s2442_s2 + $0x18] sm:$0xff] }
  0xf0   : > { %395 = vadd.xlane.f32.xlu1 %v394_v19  ;;  %374 = vadd.xlane.f32.xlu0 %v373_v33  ;;  %v1803_v19 = vld [vmem:[%s2442_s2 + $0x10] sm:$0xff] }
  0xf4   : > { %398 = vadd.xlane.f32.xlu1 %v397_v45 }
 0x161   : > { %v354_v16 = vpop.xlane.xlu0 %353 }
 0x162   : > { %v400_v35 = vmul.f32 0.003921569, %v354_v16 }
 0x164   : > { %v1787_v36 = vadd.f32 1e-06, %v400_v35 }
 0x165   : > { %v357_v12 = vpop.xlane.xlu1 %356  ;;  %v378_v37 = vpop.xlane.xlu0 %377 }
 0x166   : > { %v401_v39 = vmul.f32 0.003921569, %v357_v12  ;;  %v408_v30 = vmul.f32 0.003921569, %v378_v37  ;;  %1103 = vrsqrt.f32 %v1787_v36  ;;  %vm434_vm0 = vcmp.eq.f32.partialorder %v1787_v36, inf }
 0x167   : > { %1105 = vrcp.f32 %v1792_v26  ;;  %vm436_vm1 = vcmp.eq.f32.partialorder %v1787_v36, 0.0 }
 0x168   : > { %v1806_v42 = vadd.f32 1e-06, %v401_v39  ;;  %1107 = vrcp.f32 %v1797_v38  ;;  %v1814_v33 = vadd.f32 1e-06, %v408_v30  ;;  %v1827_v30 = vld [vmem:[%s2442_s2 + $0x20] sm:$0xff] }
 0x169   : > { %v381_v32 = vpop.xlane.xlu1 %380  ;;  %v360_v43 = vpop.xlane.xlu0 %359  ;;  %1109 = vrcp.f32 %v1803_v19 }
 0x16a   : > { %v409_v45 = vmul.f32 0.003921569, %v381_v32  ;;  %v402_v16 = vmul.f32 0.003921569, %v360_v43  ;;  %1111 = vrsqrt.f32 %v1806_v42  ;;  %v1833_v32 = vld [vmem:[%s2442_s2 + $0x28] sm:$0xff]  ;;  %vm441_vm2 = vcmp.eq.f32.partialorder %v1806_v42, inf }
 0x16b   : > { %1113 = vrcp.f32 %v1811_v44  ;;  %vm443_vm3 = vcmp.eq.f32.partialorder %v1806_v42, 0.0  ;;  %vm490_vm4 = vcmp.eq.f32.partialorder %v1814_v33, inf  ;;  %vm492_vm5 = vcmp.eq.f32.partialorder %v1814_v33, 0.0 }
 0x16c   : > { %v1818_v35 = vadd.f32 1e-06, %v409_v45  ;;  %v1820_v12 = vadd.f32 1e-06, %v402_v16  ;;  %1115 = vrsqrt.f32 %v1814_v33  ;;  %v493_v20 = vand.u32 2147483648, %v1814_v33 }
 0x16d   : > { %v384_v37 = vpop.xlane.xlu1 %383  ;;  %v363_v39 = vpop.xlane.xlu0 %362 }
 0x16e   : > { %v410_v24 = vmul.f32 0.003921569, %v384_v37  ;;  %v403_v9 = vmul.f32 0.003921569, %v363_v39  ;;  %1117 = vrsqrt.f32 %v1818_v35  ;;  %vm497_vm6 = vcmp.eq.f32.partialorder %v1818_v35, inf }
 0x16f   : > { %1119 = vrsqrt.f32 %v1820_v12  ;;  %vm499_vm7 = vcmp.eq.f32.partialorder %v1818_v35, 0.0  ;;  %vm448_vm8 = vcmp.eq.f32.partialorder %v1820_v12, inf  ;;  %vm450_vm9 = vcmp.eq.f32.partialorder %v1820_v12, 0.0 }
 0x170   : > { %v1836_v43 = vadd.f32 1e-06, %v410_v24  ;;  %v1838_v45 = vadd.f32 1e-06, %v403_v9  ;;  %1121 = vrcp.f32 %v1827_v30  ;;  %v1104_v39 = vpop.eup %1103  ;;  %v1853_v9 = vld [vmem:[%s2442_s2 + $0x38] sm:$0xff] }
 0x171   : > { %v387_v16 = vpop.xlane.xlu1 %386  ;;  %v366_v37 = vpop.xlane.xlu0 %365  ;;  %1123 = vrcp.f32 %v1833_v32 }
 0x172   : > { %v411_v31 = vmul.f32 0.003921569, %v387_v16  ;;  %v404_v63 = vmul.f32 0.003921569, %v366_v37  ;;  %v1847_v6 = vpop.eup %1105  ;;  %1125 = vrsqrt.f32 %v1836_v43  ;;  %v433_v37 = vmul.f32 %v1104_v39, %v1787_v36 }
 0x173   : > { %v1855_v24 = vpop.eup %1107  ;;  %1127 = vrsqrt.f32 %v1838_v45  ;;  %v437_v39 = vand.u32 2147483648, %v1787_v36  ;;  %vm504_vm10 = vcmp.eq.f32.partialorder %v1836_v43, inf  ;;  %vm506_vm11 = vcmp.eq.f32.partialorder %v1836_v43, 0.0 }
 0x174   : > { %v1858_v16 = vpop.eup %1109  ;;  %v1861_v56 = vadd.f32 1e-06, %v411_v31  ;;  %1129 = vrcp.f32 %v1844_v8  ;;  %v1865_v59 = vadd.f32 1e-06, %v404_v63  ;;  %v444_v63 = vand.u32 2147483648, %v1806_v42 }
 0x175   : > { %v390_v15 = vpop.xlane.xlu1 %389  ;;  %v369_v34 = vpop.xlane.xlu0 %368  ;;  %1131 = vrcp.f32 %v1853_v9  ;;  %v435_v4 = vsel %vm434_vm0, %v1787_v36, %v433_v37  ;;  %v451_v36 = vand.u32 2147483648, %v1820_v12  ;;  %vm455_vm12 = vcmp.eq.f32.partialorder %v1838_v45, inf }
 0x176   : > { %v1112_v29 = vpop.eup %1111  ;;  %v412_v58 = vmul.f32 0.003921569, %v390_v15  ;;  %1133 = vrsqrt.f32 %v1861_v56  ;;  %v405_v31 = vmul.f32 0.003921569, %v369_v34  ;;  %v438_v46 = vsel %vm436_vm1, %v437_v39, %v435_v4 }
 0x177   : > { %v1868_v55 = vpop.eup %1113  ;;  %1135 = vrsqrt.f32 %v1865_v59  ;;  %v440_v3 = vmul.f32 %v1112_v29, %v1806_v42  ;;  %v500_v29 = vand.u32 2147483648, %v1818_v35  ;;  %v507_v4 = vand.u32 2147483648, %v1836_v43 }
 0x178   : > { %v1116_v54 = vpop.eup %1115  ;;  %v1884_v60 = vadd.f32 1e-06, %v412_v58  ;;  %v1891_v5 = vadd.f32 1e-06, %v405_v31  ;;  %vm457_vm13 = vcmp.eq.f32.partialorder %v1838_v45, 0.0  ;;  %v458_v1 = vand.u32 2147483648, %v1838_v45 }
 0x179   : > { %v1118_v15 = vpop.eup %1117  ;;  %v393_v21 = vpop.xlane.xlu1 %392  ;;  %v489_v37 = vmul.f32 %v1116_v54, %v1814_v33  ;;  %v442_v54 = vsel %vm441_vm2, %v1806_v42, %v440_v3  ;;  %vm511_vm14 = vcmp.eq.f32.partialorder %v1861_v56, inf  ;;  %vm513_vm15 = vcmp.eq.f32.partialorder %v1861_v56, 0.0 }
 0x17a   : > { %v1120_v34 = vpop.eup %1119  ;;  %v496_v13 = vmul.f32 %v1118_v15, %v1818_v35  ;;  %1137 = vrsqrt.f32 %v1884_v60  ;;  %v413_v58 = vmul.f32 0.003921569, %v393_v21  ;;  %v372_v21 = vpop.xlane.xlu0 %371  ;;  %vm462_vm0 = vcmp.eq.f32.partialorder %v1865_v59, inf }
 0x17b   : > { %v1886_v14 = vpop.eup %1121  ;;  %v447_v22 = vmul.f32 %v1120_v34, %v1820_v12  ;;  %1139 = vrsqrt.f32 %v1891_v5  ;;  %v491_v3 = vsel %vm490_vm4, %v1814_v33, %v489_v37  ;;  %v445_v34 = vsel %vm443_vm3, %v444_v63, %v442_v54 }
 0x17c   : > { %v1893_v11 = vpop.eup %1123  ;;  %1141 = vrcp.f32 %v438_v46  ;;  %v498_v50 = vsel %vm497_vm6, %v1818_v35, %v496_v13  ;;  %v1924_v46 = vadd.f32 1e-06, %v413_v58  ;;  %v406_v0 = vmul.f32 0.003921569, %v372_v21 }
 0x17d   : > { %v1126_v23 = vpop.eup %1125  ;;  %v449_v37 = vsel %vm448_vm8, %v1820_v12, %v447_v22  ;;  %v494_v63 = vsel %vm492_vm5, %v493_v20, %v491_v3  ;;  %v396_v58 = vpop.xlane.xlu1 %395  ;;  %1143 = vrcp.f32 %v445_v34  ;;  %v501_v22 = vsel %vm499_vm7, %v500_v29, %v498_v50 }
 0x17e   : > { %v1128_v31 = vpop.eup %1127  ;;  %v503_v52 = vmul.f32 %v1126_v23, %v1836_v43  ;;  %v514_v23 = vand.u32 2147483648, %v1861_v56  ;;  %v452_v54 = vsel %vm450_vm9, %v451_v36, %v449_v37  ;;  %1145 = vrsqrt.f32 %v1924_v46 }
 0x17f   : > { %v1909_v39 = vpop.eup %1129  ;;  %v454_v48 = vmul.f32 %v1128_v31, %v1838_v45  ;;  %1147 = vrcp.f32 %v494_v63  ;;  %v1950_v33 = vadd.f32 1e-06, %v406_v0  ;;  %v414_v35 = vmul.f32 0.003921569, %v396_v58  ;;  %v375_v31 = vpop.xlane.xlu0 %374 }
 0x180   : > { %v1916_v15 = vpop.eup %1131  ;;  %v505_v50 = vsel %vm504_vm10, %v1836_v43, %v503_v52  ;;  %1149 = vrcp.f32 %v501_v22  ;;  %vm464_vm1 = vcmp.eq.f32.partialorder %v1865_v59, 0.0  ;;  %vm518_vm2 = vcmp.eq.f32.partialorder %v1884_v60, inf }
 0x181   : > { %v1134_v53 = vpop.eup %1133  ;;  %1151 = vrcp.f32 %v452_v54  ;;  %v508_v0 = vsel %vm506_vm11, %v507_v4, %v505_v50  ;;  %vm469_vm3 = vcmp.eq.f32.partialorder %v1891_v5, inf  ;;  %vm520_vm4 = vcmp.eq.f32.partialorder %v1884_v60, 0.0  ;;  %v399_v58 = vpop.xlane.xlu1 %398 }
 0x182   : > { %v1136_v42 = vpop.eup %1135  ;;  %v510_v13 = vmul.f32 %v1134_v53, %v1861_v56  ;;  %v456_v53 = vsel %vm455_vm12, %v1838_v45, %v454_v48  ;;  %v465_v48 = vand.u32 2147483648, %v1865_v59  ;;  %1153 = vrsqrt.f32 %v1950_v33 }
 0x183   : > { %v461_v20 = vmul.f32 %v1136_v42, %v1865_v59  ;;  %v459_v21 = vsel %vm457_vm13, %v458_v1, %v456_v53  ;;  %v1973_v45 = vadd.f32 1e-06, %v414_v35  ;;  %v407_v42 = vmul.f32 0.003921569, %v375_v31 }
 0x184   : > { %v1138_v29 = vpop.eup %1137  ;;  %v512_v12 = vsel %vm511_vm14, %v1861_v56, %v510_v13  ;;  %1155 = vrcp.f32 %v459_v21  ;;  %v521_v43 = vand.u32 2147483648, %v1884_v60  ;;  %v472_v13 = vand.u32 2147483648, %v1891_v5 }
 0x185   : > { %v1140_v36 = vpop.eup %1139  ;;  %v517_v52 = vmul.f32 %v1138_v29, %v1884_v60  ;;  %v463_v3 = vsel %vm462_vm0, %v1865_v59, %v461_v20  ;;  %v515_v1 = vsel %vm513_vm15, %v514_v23, %v512_v12  ;;  %1157 = vrcp.f32 %v508_v0  ;;  %v1990_v23 = vld [vmem:[%s2441_s1 + $0x8] sm:$0xff]  ;;  %v1999_v20 = vld [vmem:[%s2441_s1] sm:$0xff]  ;;  %v2009_v12 = vld [vmem:[%s2441_s1 + $0x10] sm:$0xff] }
 0x186   : > { %v468_v34 = vmul.f32 %v1140_v36, %v1891_v5  ;;  %v1968_v37 = vpop.eup %1141  ;;  %v466_v63 = vsel %vm464_vm1, %v465_v48, %v463_v3  ;;  %1159 = vrcp.f32 %v515_v1  ;;  %vm471_vm5 = vcmp.eq.f32.partialorder %v1891_v5, 0.0  ;;  %v2032_v0 = vld [vmem:[%s2441_s1 + $0x20] sm:$0xff] }
 0x187   : > { %v519_v56 = vsel %vm518_vm2, %v1884_v60, %v517_v52  ;;  %v1985_v22 = vpop.eup %1143  ;;  %vm525_vm6 = vcmp.eq.f32.partialorder %v1924_v46, inf  ;;  %1161 = vrsqrt.f32 %v1973_v45  ;;  %v1994_v59 = vadd.f32 1e-06, %v407_v42  ;;  %v2027_v52 = vld [vmem:[%s2441_s1 + $0x18] sm:$0xff] }
 0x188   : > { %v470_v4 = vsel %vm469_vm3, %v1891_v5, %v468_v34  ;;  %v1146_v53 = vpop.eup %1145  ;;  %1163 = vrcp.f32 %v466_v63  ;;  %v522_v5 = vsel %vm520_vm4, %v521_v43, %v519_v56  ;;  %v528_v50 = vand.u32 2147483648, %v1924_v46 }
 0x189   : > { %v473_v54 = vsel %vm471_vm5, %v472_v13, %v470_v4  ;;  %v415_v35 = vmul.f32 0.003921569, %v399_v58  ;;  %v2004_v29 = vpop.eup %1147  ;;  %v524_v48 = vmul.f32 %v1146_v53, %v1924_v46  ;;  %vm527_vm7 = vcmp.eq.f32.partialorder %v1924_v46, 0.0  ;;  %v2056_v4 = vld [vmem:[%s2441_s1 + $0x28] sm:$0xff] }
 0x18a   : > { %1165 = vrsqrt.f32 %v1994_v59  ;;  %v2014_v31 = vpop.eup %1149  ;;  %v2018_v60 = vmul.f32 %v1855_v24, %v1990_v23  ;;  %v593_v36 = vmul.f32 %v1985_v22, %v1583_v57  ;;  %v2038_v24 = vmul.f32 %v1847_v6, %v1999_v20 }
 0x18b   : > { %1167 = vrcp.f32 %v473_v54  ;;  %v2022_v21 = vadd.f32 1e-06, %v415_v35  ;;  %v2034_v3 = vpop.eup %1151  ;;  %v526_v57 = vsel %vm525_vm6, %v1924_v46, %v524_v48  ;;  %v592_v1 = vmul.f32 %v1968_v37, %v1563_v49  ;;  %v2061_v49 = vld [vmem:[%s2441_s1 + $0x30] sm:$0xff] }
 0x18c   : > { %1169 = vrcp.f32 %v522_v5  ;;  %v1154_v34 = vpop.eup %1153  ;;  %v2047_v42 = vmul.f32 %v1858_v16, %v2009_v12  ;;  %v529_v43 = vsel %vm527_vm7, %v528_v50, %v526_v57  ;;  %v2065_v16 = vmul.f32 %v1868_v55, %v2027_v52 }
 0x18d   : > { %1171 = vrsqrt.f32 %v2022_v21  ;;  %v475_v6 = vmul.f32 %v1154_v34, %v1950_v33  ;;  %v2069_v46 = vmul.f32 %v1886_v14, %v2032_v0  ;;  %v609_v56 = vsub.f32 %v593_v36, %v2018_v60 }
 0x18e   : > { %1173 = vrcp.f32 %v529_v43  ;;  %v2071_v63 = vpop.eup %1155  ;;  %v600_v13 = vmul.f32 %v2004_v29, %v1565_v51  ;;  %vm476_vm8 = vcmp.eq.f32.partialorder %v1950_v33, inf  ;;  %v479_v58 = vand.u32 2147483648, %v1950_v33 }
 0x18f   : > { %v2078_v54 = vpop.eup %1157  ;;  %v601_v55 = vmul.f32 %v2014_v31, %v1589_v61  ;;  %v594_v14 = vmul.f32 %v2034_v3, %v1611_v10  ;;  %v477_v53 = vsel %vm476_vm8, %v1950_v33, %v475_v6  ;;  %vm478_vm9 = vcmp.eq.f32.partialorder %v1950_v33, 0.0 }
 0x190   : > { %v2086_v5 = vpop.eup %1159  ;;  %v608_v51 = vsub.f32 %v592_v1, %v2038_v24  ;;  %v480_v50 = vsel %vm478_vm9, %v479_v58, %v477_v53  ;;  %v2091_v35 = vmul.f32 %v1893_v11, %v2056_v4  ;;  %v2095_v48 = vmul.f32 %v1909_v39, %v2061_v49 }
 0x191   : > { %v1162_v61 = vpop.eup %1161  ;;  %v595_v10 = vmul.f32 %v2071_v63, %v1639_v40  ;;  %1175 = vrcp.f32 %v480_v50  ;;  %vm532_vm10 = vcmp.eq.f32.partialorder %v1973_v45, inf  ;;  %v535_v33 = vand.u32 2147483648, %v1973_v45 }
 0x192   : > { %vm640_vm11 = vcmask 15360   ;;  %v2101_v36 = vpop.eup %1163  ;;  %v625_v57 = vand.u32 2147483647, %v609_v56  ;;  %v616_v11 = vsub.f32 %v600_v13, %v2038_v24  ;;  %v531_v34 = vmul.f32 %v1162_v61, %v1973_v45 }
 0x193   : > { %vm534_vm12 = vcmp.eq.f32.partialorder %v1973_v45, 0.0  ;;  %v617_v1 = vsub.f32 %v601_v55, %v2018_v60  ;;  %v610_v40 = vsub.f32 %v594_v14, %v2047_v42  ;;  %v602_v43 = vmul.f32 %v2078_v54, %v1617_v17 }
 0x194   : > { %v1166_v39 = vpop.eup %1165  ;;  %vm483_vm13 = vcmp.eq.f32.partialorder %v1994_v59, inf  ;;  %v533_v56 = vsel %vm532_vm10, %v1973_v45, %v531_v34  ;;  %vm485_vm14 = vcmp.eq.f32.partialorder %v1994_v59, 0.0  ;;  %v486_v13 = vand.u32 2147483648, %v1994_v59 }
 0x195   : > { %v2111_v6 = vpop.eup %1167  ;;  %v482_v24 = vmul.f32 %v1166_v39, %v1994_v59  ;;  %v603_v60 = vmul.f32 %v2086_v5, %v1645_v47  ;;  %v596_v17 = vmul.f32 %v2101_v36, %v1667_v62  ;;  %v536_v55 = vsel %vm534_vm12, %v535_v33, %v533_v56 }
 0x196   : > { %v2117_v58 = vpop.eup %1169  ;;  %v611_v14 = vsub.f32 %v595_v10, %v2065_v16  ;;  %1177 = vrcp.f32 %v536_v55  ;;  %vm539_vm15 = vcmp.eq.f32.partialorder %v2022_v21, inf  ;;  %v542_v50 = vand.u32 2147483648, %v2022_v21 }
 0x197   : > { %v1172_v53 = vpop.eup %1171  ;;  %v484_v45 = vsel %vm483_vm13, %v1994_v59, %v482_v24  ;;  %vm541_vm0 = vcmp.eq.f32.partialorder %v2022_v21, 0.0  ;;  %v597_v47 = vmul.f32 %v2111_v6, %v1695_v28  ;;  %v624_v62 = vand.u32 2147483647, %v608_v51 }
 0x198   : > { %v2127_v61 = vpop.eup %1173  ;;  %v487_v34 = vsel %vm485_vm14, %v486_v13, %v484_v45  ;;  %v538_v39 = vmul.f32 %v1172_v53, %v2022_v21  ;;  %v618_v10 = vsub.f32 %v602_v43, %v2047_v42  ;;  %v604_v59 = vmul.f32 %v2117_v58, %v1673_v7 }
 0x199   : > { %1179 = vrcp.f32 %v487_v34  ;;  %v633_v33 = vand.u32 2147483647, %v617_v1  ;;  %v626_v56 = vand.u32 2147483647, %v610_v40  ;;  %v612_v13 = vsub.f32 %v596_v17, %v2069_v46 }
 0x19a   : > { %v540_v24 = vsel %vm539_vm15, %v2022_v21, %v538_v39  ;;  %v642_v53 = vsel %vm640_vm11, %v625_v57, 0.0  ;;  %v605_v45 = vmul.f32 %v2127_v61, %v1701_v41  ;;  %v619_v28 = vsub.f32 %v603_v60, %v2065_v16  ;;  %v2148_v21 = vld [vmem:[%s2441_s1 + $0x38] sm:$0xff] }
 0x19b   : > { %v543_v55 = vsel %vm541_vm0, %v542_v50, %v540_v24  ;;  %v2142_v51 = vpop.eup %1175  ;;  %v632_v42 = vand.u32 2147483647, %v616_v11  ;;  %v613_v7 = vsub.f32 %v597_v47, %v2091_v35  ;;  %v627_v1 = vand.u32 2147483647, %v611_v14 }
 0x19c   : > { %1181 = vrcp.f32 %v543_v55  ;;  %v634_v40 = vand.u32 2147483647, %v618_v10  ;;  %v598_v57 = vmul.f32 %v2142_v51, %v1723_v18  ;;  %v641_v41 = vsel %vm640_vm11, %v624_v62, 0.0 }
 0x19d   : > { %v620_v16 = vsub.f32 %v604_v59, %v2069_v46  ;;  %v628_v43 = vand.u32 2147483647, %v612_v13  ;;  %v643_v60 = vadd.f32 %v642_v53, %v641_v41  ;;  %v644_v11 = vsel %vm640_vm11, %v626_v56, 0.0 }
 0x19e   : > { %v614_v17 = vsub.f32 %v598_v57, %v2095_v48  ;;  %v621_v14 = vsub.f32 %v605_v45, %v2091_v35  ;;  %v635_v50 = vand.u32 2147483647, %v619_v28  ;;  %v663_v34 = vsel %vm640_vm11, %v633_v33, 0.0 }
 0x19f   : > { %v591_v39 = vmul.f32 %v1916_v15, %v2148_v21  ;;  %v629_v47 = vand.u32 2147483647, %v613_v7  ;;  %v646_v18 = vsel %vm640_vm11, %v627_v1, 0.0  ;;  %v645_v46 = vadd.f32 %v644_v11, %v643_v60 }
 0x1a0   : > { %v2161_v62 = vpop.eup %1177  ;;  %v636_v10 = vand.u32 2147483647, %v620_v16  ;;  %v662_v59 = vsel %vm640_vm11, %v632_v42, 0.0  ;;  %v665_v56 = vsel %vm640_vm11, %v634_v40, 0.0  ;;  %v630_v24 = vand.u32 2147483647, %v614_v17 }
 0x1a1   : > { %v648_v35 = vsel %vm640_vm11, %v628_v43, 0.0  ;;  %v606_v33 = vmul.f32 %v2161_v62, %v1729_v2  ;;  %v664_v13 = vadd.f32 %v663_v34, %v662_v59  ;;  %v647_v15 = vadd.f32 %v646_v18, %v645_v46 }
 0x1a2   : > { %v637_v53 = vand.u32 2147483647, %v621_v14  ;;  %v667_v45 = vsel %vm640_vm11, %v635_v50, 0.0  ;;  %v650_v42 = vsel %vm640_vm11, %v629_v47, 0.0  ;;  %v669_v57 = vsel %vm640_vm11, %v636_v10, 0.0 }
 0x1a3   : > { %v2168_v55 = vpop.eup %1179  ;;  %v622_v7 = vsub.f32 %v606_v33, %v2095_v48  ;;  %v666_v1 = vadd.f32 %v665_v56, %v664_v13  ;;  %v649_v40 = vadd.f32 %v648_v35, %v647_v15  ;;  %v652_v16 = vsel %vm640_vm11, %v630_v24, 0.0 }
 0x1a4   : > { %v599_v28 = vmul.f32 %v2168_v55, %v1751_v25  ;;  %v671_v25 = vsel %vm640_vm11, %v637_v53, 0.0 }
 0x1a5   : > { %v638_v43 = vand.u32 2147483647, %v622_v7  ;;  %v668_v60 = vadd.f32 %v667_v45, %v666_v1  ;;  %v651_v11 = vadd.f32 %v650_v42, %v649_v40 }
 0x1a6   : > { %v2176_v41 = vpop.eup %1181  ;;  %v615_v2 = vsub.f32 %v599_v28, %v591_v39 }
 0x1a7   : > { %v607_v17 = vmul.f32 %v2176_v41, %v1757_v27  ;;  %v670_v50 = vadd.f32 %v669_v57, %v668_v60  ;;  %v653_v48 = vadd.f32 %v652_v16, %v651_v11  ;;  %v673_v47 = vsel %vm640_vm11, %v638_v43, 0.0 }
 0x1a8   : > { %v631_v14 = vand.u32 2147483647, %v615_v2 }
 0x1a9   : > { %v623_v34 = vsub.f32 %v607_v17, %v591_v39  ;;  %v672_v46 = vadd.f32 %v671_v25, %v670_v50 }
 0x1aa   : > { %v654_v18 = vsel %vm640_vm11, %v631_v14, 0.0 }
 0x1ab   : > { %v655_v10 = vadd.f32 %v654_v18, %v653_v48  ;;  %v639_v59 = vand.u32 2147483647, %v623_v34  ;;  %v674_v56 = vadd.f32 %v673_v47, %v672_v46 }
 0x1ad   : > { %v656_v24 = vrot.slane %v655_v10, 4  ;;  %v675_v35 = vsel %vm640_vm11, %v639_v59, 0.0 }
 0x1ae   : > { %v676_v33 = vadd.f32 %v675_v35, %v674_v56 }
 0x1af   : > { %v657_v13 = vadd.f32 %v656_v24, %v655_v10 }
 0x1b0   : > { %v677_v27 = vrot.slane %v676_v33, 4 }
 0x1b1   : > { %v658_v15 = vrot.slane %v657_v13, 2 }
 0x1b2   : > { %v678_v53 = vadd.f32 %v677_v27, %v676_v33 }
 0x1b3   : > { %v659_v45 = vadd.f32 %v658_v15, %v657_v13 }
 0x1b4   : > { %v679_v28 = vrot.slane %v678_v53, 2 }
 0x1b5   : > { %v660_v42 = vrot.slane %v659_v45, 1 }
 0x1b6   : > { %v680_v39 = vadd.f32 %v679_v28, %v678_v53 }
 0x1b7   : > { %v661_v7 = vadd.f32 %v660_v42, %v659_v45 }
 0x1b8   : > { %v681_v1 = vrot.slane %v680_v39, 1 }
 0x1b9   : > { %v683_v40 = vmul.f32 0.015625, %v661_v7 }
 0x1ba   : > { %v682_v57 = vadd.f32 %v681_v1, %v680_v39 }
 0x1bb   : > { %v685_v2 = vadd.f32 1.0, %v683_v40 }
 0x1bc   : > { %v684_v16 = vmul.f32 0.015625, %v682_v57 }
 0x1bd   : > { %1183 = vrcp.f32 %v685_v2 }
 0x1be   : > { %v686_v43 = vadd.f32 1.0, %v684_v16 }
 0x1c0   : > { %1185 = vrcp.f32 %v686_v43 }
 0x1c7   : > { %v1184_v60 = vpop.eup %1183 }
 0x1c8   : > { %v691_v11 = vmul.f32 1.442695, %v1184_v60 }
 0x1ca   : > { %v1186_v17 = vpop.eup %1185  ;;  %1187 = vpow2.f32 %v691_v11 }
 0x1cb   : > { %v693_v25 = vmul.f32 1.442695, %v1186_v17 }
 0x1cd   : > { %1189 = vpow2.f32 %v693_v25 }
 0x1d4   : > { %v1188_v14 = vpop.eup %1187 }
 0x1d5   : > { %v695_v50 = vsel %vm640_vm11, %v1188_v14, 0.0 }
 0x1d6   : > { %696 = vadd.xlane.f32.xlu0 %v695_v50 }
 0x1d7   : > { %v1190_v48 = vpop.eup %1189 }
 0x1d8   : > { %v698_v34 = vsel %vm640_vm11, %v1190_v48, 0.0 }
 0x1d9   : > { %699 = vadd.xlane.f32.xlu1 %v698_v34 }
 0x263   : > { %v697_v47 = vpop.xlane.xlu0 %696 }
 0x264   : > { %1191 = vrcp.f32 %v697_v47 }
 0x266   : > { %v700_v18 = vpop.xlane.xlu1 %699 }
 0x267   : > { %1193 = vrcp.f32 %v700_v18 }
 0x26e   : > { %v1192_v46 = vpop.eup %1191 }
 0x26f   : > { %v2187_v10 = vmul.f32 %v1192_v46, %v1188_v14 }
 0x271   : > { %v770_v59 = vmul.f32 %v2187_v10, %v1797_v38  ;;  %v769_v56 = vmul.f32 %v2187_v10, %v1792_v26  ;;  %v772_v33 = vmul.f32 %v2187_v10, %v1811_v44  ;;  %v771_v13 = vmul.f32 %v2187_v10, %v1803_v19  ;;  %v1194_v27 = vpop.eup %1193 }
 0x272   : > { %v774_v45 = vmul.f32 %v2187_v10, %v1833_v32  ;;  %v773_v28 = vmul.f32 %v2187_v10, %v1827_v30  ;;  %v2205_v42 = vmul.f32 %v1194_v27, %v1190_v48  ;;  %v776_v1 = vmul.f32 %v2187_v10, %v1853_v9 }
 0x273   : > { %v788_v24 = vsel %vm640_vm11, %v770_v59, 0.0  ;;  %v785_v35 = vsel %vm640_vm11, %v769_v56, 0.0  ;;  %v794_v15 = vsel %vm640_vm11, %v772_v33, 0.0  ;;  %v791_v53 = vsel %vm640_vm11, %v771_v13, 0.0 }
 0x274   : > { %789 = vadd.xlane.f32.xlu1 %v788_v24  ;;  %786 = vadd.xlane.f32.xlu0 %v785_v35  ;;  %v800_v39 = vsel %vm640_vm11, %v774_v45, 0.0  ;;  %v797_v7 = vsel %vm640_vm11, %v773_v28, 0.0  ;;  %v775_v40 = vmul.f32 %v2187_v10, %v1844_v8  ;;  %v806_v57 = vsel %vm640_vm11, %v776_v1, 0.0 }
 0x275   : > { %v778_v16 = vmul.f32 %v2205_v42, %v1797_v38  ;;  %v777_v43 = vmul.f32 %v2205_v42, %v1792_v26  ;;  %v780_v17 = vmul.f32 %v2205_v42, %v1811_v44  ;;  %v779_v25 = vmul.f32 %v2205_v42, %v1803_v19 }
 0x276   : > { %v803_v2 = vsel %vm640_vm11, %v775_v40, 0.0  ;;  %v782_v26 = vmul.f32 %v2205_v42, %v1833_v32  ;;  %v781_v50 = vmul.f32 %v2205_v42, %v1827_v30  ;;  %v784_v19 = vmul.f32 %v2205_v42, %v1853_v9 }
 0x277   : > { %v812_v60 = vsel %vm640_vm11, %v778_v16, 0.0  ;;  %v809_v11 = vsel %vm640_vm11, %v777_v43, 0.0  ;;  %v818_v14 = vsel %vm640_vm11, %v780_v17, 0.0  ;;  %v815_v38 = vsel %vm640_vm11, %v779_v25, 0.0 }
 0x278   : > { %795 = vadd.xlane.f32.xlu1 %v794_v15  ;;  %792 = vadd.xlane.f32.xlu0 %v791_v53  ;;  %v824_v48 = vsel %vm640_vm11, %v782_v26, 0.0  ;;  %v821_v44 = vsel %vm640_vm11, %v781_v50, 0.0  ;;  %v783_v34 = vmul.f32 %v2205_v42, %v1844_v8  ;;  %v830_v47 = vsel %vm640_vm11, %v784_v19, 0.0 }
 0x279   : > { %v706_v30 = vmul.f32 %v2187_v10, %v1990_v23  ;;  %v705_v18 = vmul.f32 %v2187_v10, %v1999_v20  ;;  %v708_v8 = vmul.f32 %v2187_v10, %v2027_v52  ;;  %v707_v59 = vmul.f32 %v2187_v10, %v2009_v12 }
 0x27a   : > { %v827_v32 = vsel %vm640_vm11, %v783_v34, 0.0  ;;  %v710_v35 = vmul.f32 %v2187_v10, %v2056_v4  ;;  %v709_v33 = vmul.f32 %v2187_v10, %v2032_v0  ;;  %v712_v15 = vmul.f32 %v2187_v10, %v2148_v21 }
 0x27b   : > { %v724_v46 = vsel %vm640_vm11, %v706_v30, 0.0  ;;  %v721_v9 = vsel %vm640_vm11, %v705_v18, 0.0  ;;  %v730_v56 = vsel %vm640_vm11, %v708_v8, 0.0  ;;  %v727_v24 = vsel %vm640_vm11, %v707_v59, 0.0  ;;  %v2515_v59 = vld [vmem:[#allocation13_spill] sm:$0xff] }
 0x27c   : > { %801 = vadd.xlane.f32.xlu1 %v800_v39  ;;  %798 = vadd.xlane.f32.xlu0 %v797_v7  ;;  %v736_v13 = vsel %vm640_vm11, %v710_v35, 0.0  ;;  %v733_v27 = vsel %vm640_vm11, %v709_v33, 0.0  ;;  %v711_v53 = vmul.f32 %v2187_v10, %v2061_v49  ;;  %v742_v45 = vsel %vm640_vm11, %v712_v15, 0.0  ;;  %v2517_v33 = vld [vmem:[#allocation9_spill] sm:$0xff] }
 0x27d   : > { %v714_v39 = vmul.f32 %v2205_v42, %v1990_v23  ;;  %v713_v7 = vmul.f32 %v2205_v42, %v1999_v20  ;;  %v716_v10 = vmul.f32 %v2205_v42, %v2027_v52  ;;  %v718_v20 = vmul.f32 %v2205_v42, %v2056_v4 }
 0x27e   : > { %v739_v28 = vsel %vm640_vm11, %v711_v53, 0.0  ;;  %v717_v16 = vmul.f32 %v2205_v42, %v2032_v0 }
 0x27f   : > { %v748_v1 = vsel %vm640_vm11, %v714_v39, 0.0  ;;  %v745_v40 = vsel %vm640_vm11, %v713_v7, 0.0  ;;  %v760_v43 = vsel %vm640_vm11, %v718_v20, 0.0  ;;  %v2518_v39 = vld [vmem:[#allocation20_spill] sm:$0xff] }
 0x280   : > { %807 = vadd.xlane.f32.xlu1 %v806_v57  ;;  %804 = vadd.xlane.f32.xlu0 %v803_v2  ;;  %v715_v57 = vmul.f32 %v2205_v42, %v2009_v12  ;;  %v754_v2 = vsel %vm640_vm11, %v716_v10, 0.0  ;;  %v757_v52 = vsel %vm640_vm11, %v717_v16, 0.0  ;;  %v720_v12 = vmul.f32 %v2205_v42, %v2148_v21  ;;  %v2520_v10 = vld [vmem:[#allocation16_spill] sm:$0xff] }
 0x282   : > { %v751_v23 = vsel %vm640_vm11, %v715_v57, 0.0 }
 0x284   : > { %813 = vadd.xlane.f32.xlu1 %v812_v60  ;;  %810 = vadd.xlane.f32.xlu0 %v809_v11  ;;  %v719_v60 = vmul.f32 %v2205_v42, %v2061_v49  ;;  %v766_v11 = vsel %vm640_vm11, %v720_v12, 0.0  ;;  %v2522_v12 = vld [vmem:[#allocation28_spill] sm:$0xff] }
 0x286   : > { %v763_v4 = vsel %vm640_vm11, %v719_v60, 0.0 }
 0x288   : > { %819 = vadd.xlane.f32.xlu1 %v818_v14  ;;  %816 = vadd.xlane.f32.xlu0 %v815_v38 }
 0x28c   : > { %825 = vadd.xlane.f32.xlu1 %v824_v48  ;;  %822 = vadd.xlane.f32.xlu0 %v821_v44 }
 0x290   : > { %831 = vadd.xlane.f32.xlu1 %v830_v47  ;;  %828 = vadd.xlane.f32.xlu0 %v827_v32 }
 0x294   : > { %725 = vadd.xlane.f32.xlu1 %v724_v46  ;;  %722 = vadd.xlane.f32.xlu0 %v721_v9  ;;  %v2514_v46 = vld [vmem:[#allocation12_spill] sm:$0xff] }
 0x298   : > { %731 = vadd.xlane.f32.xlu1 %v730_v56  ;;  %728 = vadd.xlane.f32.xlu0 %v727_v24  ;;  %v2516_v24 = vld [vmem:[#allocation8_spill] sm:$0xff] }
 0x29c   : > { %737 = vadd.xlane.f32.xlu1 %v736_v13  ;;  %734 = vadd.xlane.f32.xlu0 %v733_v27 }
 0x2a0   : > { %743 = vadd.xlane.f32.xlu1 %v742_v45  ;;  %740 = vadd.xlane.f32.xlu0 %v739_v28 }
 0x2a4   : > { %749 = vadd.xlane.f32.xlu1 %v748_v1  ;;  %746 = vadd.xlane.f32.xlu0 %v745_v40 }
 0x2a8   : > { %755 = vadd.xlane.f32.xlu1 %v754_v2  ;;  %752 = vadd.xlane.f32.xlu0 %v751_v23  ;;  %v2521_v2 = vld [vmem:[#allocation17_spill] sm:$0xff] }
 0x2ac   : > { %761 = vadd.xlane.f32.xlu1 %v760_v43  ;;  %758 = vadd.xlane.f32.xlu0 %v757_v52 }
 0x2b0   : > { %767 = vadd.xlane.f32.xlu1 %v766_v11  ;;  %764 = vadd.xlane.f32.xlu0 %v763_v4  ;;  %v2523_v4 = vld [vmem:[#allocation29_spill] sm:$0xff] }
 0x301   : > { %v790_v0 = vpop.xlane.xlu1 %789  ;;  %v787_v17 = vpop.xlane.xlu0 %786 }
 0x302   : > { %v834_v47 = vmul.f32 %v1985_v22, %v790_v0  ;;  %v833_v32 = vmul.f32 %v1968_v37, %v787_v17  ;;  %v2524_v17 = vld [vmem:[#allocation24_spill] sm:$0xff] }
 0x304   : > { %v851_v9 = vmul.f32 %v834_v47, %v2514_v46  ;;  %v852_v56 = vmul.f32 %v834_v47, %v2515_v59  ;;  %v849_v35 = vmul.f32 %v833_v32, %v2516_v24  ;;  %v850_v13 = vmul.f32 %v833_v32, %v2517_v33  ;;  %v2527_v24 = vld [vmem:[#allocation37_spill] sm:$0xff] }
 0x305   : > { %v796_v25 = vpop.xlane.xlu1 %795  ;;  %v793_v14 = vpop.xlane.xlu0 %792  ;;  %v2529_v33 = vld [vmem:[#allocation33_spill] sm:$0xff] }
 0x306   : > { %v836_v8 = vmul.f32 %v2071_v63, %v796_v25  ;;  %v835_v27 = vmul.f32 %v2034_v3, %v793_v14  ;;  %v2519_v63 = vld [vmem:[#allocation21_spill] sm:$0xff] }
 0x307   : > { %v2525_v14 = vld [vmem:[#allocation25_spill] sm:$0xff] }
 0x308   : > { %v855_v7 = vmul.f32 %v836_v8, %v2518_v39  ;;  %v856_v40 = vmul.f32 %v836_v8, %v2519_v63  ;;  %v853_v57 = vmul.f32 %v835_v27, %v2520_v10  ;;  %v854_v23 = vmul.f32 %v835_v27, %v2521_v2  ;;  %v2526_v8 = vld [vmem:[#allocation36_spill] sm:$0xff]  ;;  %v2533_v63 = vld [vmem:[#allocation11_spill] sm:$0xff] }
 0x309   : > { %v802_v38 = vpop.xlane.xlu1 %801  ;;  %v799_v26 = vpop.xlane.xlu0 %798 }
 0x30a   : > { %v838_v1 = vmul.f32 %v2111_v6, %v802_v38  ;;  %v837_v20 = vmul.f32 %v2101_v36, %v799_v26 }
 0x30c   : > { %v859_v60 = vmul.f32 %v838_v1, %v2522_v12  ;;  %v860_v0 = vmul.f32 %v838_v1, %v2523_v4  ;;  %v857_v25 = vmul.f32 %v837_v20, %v2524_v17  ;;  %v858_v38 = vmul.f32 %v837_v20, %v2525_v14 }
 0x30d   : > { %v808_v50 = vpop.xlane.xlu1 %807  ;;  %v805_v48 = vpop.xlane.xlu0 %804 }
 0x30e   : > { %v840_v11 = vmul.f32 %v2168_v55, %v808_v50  ;;  %v839_v26 = vmul.f32 %v2142_v51, %v805_v48  ;;  %v2528_v48 = vld [vmem:[#allocation32_spill] sm:$0xff] }
 0x310   : > { %v863_v59 = vmul.f32 %v840_v11, %v2526_v8  ;;  %v864_v51 = vmul.f32 %v840_v11, %v2527_v24 }
 0x311   : > { %v814_v21 = vpop.xlane.xlu1 %813  ;;  %v811_v44 = vpop.xlane.xlu0 %810 }
 0x312   : > { %v841_v27 = vmul.f32 %v2004_v29, %v811_v44  ;;  %v2531_v29 = vld [vmem:[#allocation15_spill] sm:$0xff] }
 0x315   : > { %v2287_v19 = vpop.xlane.xlu1 %819  ;;  %v2289_v49 = vpop.xlane.xlu0 %816 }
 0x316   : > { %v844_v39 = vmul.f32 %v2086_v5, %v2287_v19  ;;  %v843_v10 = vmul.f32 %v2078_v54, %v2289_v49  ;;  %v2535_v54 = vld [vmem:[#allocation23_spill] sm:$0xff] }
 0x318   : > { %v872_v49 = vmul.f32 %v844_v39, %v2535_v54 }
 0x319   : > { %v2291_v42 = vpop.xlane.xlu1 %825  ;;  %v2293_v34 = vpop.xlane.xlu0 %822 }
 0x31d   : > { %v2297_v30 = vpop.xlane.xlu1 %831  ;;  %v2299_v18 = vpop.xlane.xlu0 %828 }
 0x321   : > { %v726_v22 = vpop.xlane.xlu1 %725  ;;  %v723_v15 = vpop.xlane.xlu0 %722 }
 0x322   : > { %v883_v37 = vadd.f32 %v851_v9, %v726_v22  ;;  %v884_v53 = vadd.f32 %v852_v56, %v726_v22  ;;  %v881_v45 = vadd.f32 %v849_v35, %v723_v15  ;;  %v882_v28 = vadd.f32 %v850_v13, %v723_v15 }
 0x323   : > { %v842_v56 = vmul.f32 %v2014_v31, %v814_v21  ;;  %v861_v35 = vmul.f32 %v839_v26, %v2528_v48  ;;  %v862_v13 = vmul.f32 %v839_v26, %v2529_v33 }
 0x324   : > { %915 = vst [vmem:[%s2315_s23 + $0x10] sm:$0xff] %v883_v37  ;;  %916 = vst [vmem:[%s2315_s23 + $0x18] sm:$0xff] %v884_v53 }
 0x325   : > { %913 = vst [vmem:[%s2315_s23] sm:$0xff] %v881_v45  ;;  %914 = vst [vmem:[%s2315_s23 + $0x8] sm:$0xff] %v882_v28  ;;  %v732_v3 = vpop.xlane.xlu1 %731  ;;  %v729_v6 = vpop.xlane.xlu0 %728  ;;  %v2530_v45 = vld [vmem:[#allocation14_spill] sm:$0xff]  ;;  %v868_v44 = vmul.f32 %v842_v56, %v2531_v29 }
 0x326   : > { %v887_v16 = vadd.f32 %v855_v7, %v732_v3  ;;  %v888_v43 = vadd.f32 %v856_v40, %v732_v3  ;;  %v885_v36 = vadd.f32 %v853_v57, %v729_v6  ;;  %v886_v52 = vadd.f32 %v854_v23, %v729_v6  ;;  %v2532_v7 = vld [vmem:[#allocation10_spill] sm:$0xff] }
 0x327   : > { %v867_v28 = vmul.f32 %v842_v56, %v2530_v45  ;;  %v865_v1 = vmul.f32 %v841_v27, %v2532_v7  ;;  %v866_v40 = vmul.f32 %v841_v27, %v2533_v63  ;;  %v2534_v3 = vld [vmem:[#allocation22_spill] sm:$0xff] }
 0x328   : > { %919 = vst [vmem:[%s2315_s23 + $0x30] sm:$0xff] %v887_v16  ;;  %920 = vst [vmem:[%s2315_s23 + $0x38] sm:$0xff] %v888_v43  ;;  %v871_v6 = vmul.f32 %v844_v39, %v2534_v3  ;;  %v846_v16 = vmul.f32 %v2127_v61, %v2291_v42  ;;  %v2536_v43 = vld [vmem:[#allocation18_spill] sm:$0xff] }
 0x329   : > { %917 = vst [vmem:[%s2315_s23 + $0x20] sm:$0xff] %v885_v36  ;;  %918 = vst [vmem:[%s2315_s23 + $0x28] sm:$0xff] %v886_v52  ;;  %v738_v47 = vpop.xlane.xlu1 %737  ;;  %v735_v32 = vpop.xlane.xlu0 %734  ;;  %v869_v36 = vmul.f32 %v843_v10, %v2536_v43  ;;  %v2537_v52 = vld [vmem:[#allocation19_spill] sm:$0xff] }
 0x32a   : > { %v891_v46 = vadd.f32 %v859_v60, %v738_v47  ;;  %v892_v55 = vadd.f32 %v860_v0, %v738_v47  ;;  %v889_v50 = vadd.f32 %v857_v25, %v735_v32  ;;  %v890_v9 = vadd.f32 %v858_v38, %v735_v32  ;;  %v2538_v25 = vld [vmem:[#allocation30_spill] sm:$0xff]  ;;  %v2539_v38 = vld [vmem:[#allocation31_spill] sm:$0xff] }
 0x32b   : > { %v870_v12 = vmul.f32 %v843_v10, %v2537_v52  ;;  %v845_v60 = vmul.f32 %v2117_v58, %v2293_v34  ;;  %v875_v14 = vmul.f32 %v846_v16, %v2538_v25  ;;  %v876_v26 = vmul.f32 %v846_v16, %v2539_v38  ;;  %v2540_v58 = vld [vmem:[#allocation26_spill] sm:$0xff]  ;;  %v2541_v47 = vld [vmem:[#allocation27_spill] sm:$0xff] }
 0x32c   : > { %923 = vst [vmem:[%s2315_s23 + $0x50] sm:$0xff] %v891_v46  ;;  %924 = vst [vmem:[%s2315_s23 + $0x58] sm:$0xff] %v892_v55  ;;  %v848_v46 = vmul.f32 %v2176_v41, %v2297_v30  ;;  %v847_v55 = vmul.f32 %v2161_v62, %v2299_v18  ;;  %v2542_v62 = vld [vmem:[#allocation38_spill] sm:$0xff]  ;;  %v2543_v30 = vld [vmem:[#allocation39_spill] sm:$0xff] }
 0x32d   : > { %921 = vst [vmem:[%s2315_s23 + $0x40] sm:$0xff] %v889_v50  ;;  %922 = vst [vmem:[%s2315_s23 + $0x48] sm:$0xff] %v890_v9  ;;  %v744_v22 = vpop.xlane.xlu1 %743  ;;  %v741_v15 = vpop.xlane.xlu0 %740  ;;  %v873_v34 = vmul.f32 %v845_v60, %v2540_v58  ;;  %v874_v32 = vmul.f32 %v845_v60, %v2541_v47 }
 0x32e   : > { %v895_v37 = vadd.f32 %v863_v59, %v744_v22  ;;  %v896_v31 = vadd.f32 %v864_v51, %v744_v22  ;;  %v893_v21 = vadd.f32 %v861_v35, %v741_v15  ;;  %v894_v53 = vadd.f32 %v862_v13, %v741_v15  ;;  %v2544_v51 = vld [vmem:[#allocation34_spill] sm:$0xff]  ;;  %v2545_v35 = vld [vmem:[#allocation35_spill] sm:$0xff] }
 0x32f   : > { %v879_v41 = vmul.f32 %v848_v46, %v2542_v62  ;;  %v880_v18 = vmul.f32 %v848_v46, %v2543_v30  ;;  %v877_v48 = vmul.f32 %v847_v55, %v2544_v51  ;;  %v878_v33 = vmul.f32 %v847_v55, %v2545_v35 }
 0x330   : > { %927 = vst [vmem:[%s2315_s23 + $0x70] sm:$0xff] %v895_v37  ;;  %928 = vst [vmem:[%s2315_s23 + $0x78] sm:$0xff] %v896_v31 }
 0x331   : > { %925 = vst [vmem:[%s2315_s23 + $0x60] sm:$0xff] %v893_v21  ;;  %926 = vst [vmem:[%s2315_s23 + $0x68] sm:$0xff] %v894_v53  ;;  %v750_v57 = vpop.xlane.xlu1 %749  ;;  %v747_v2 = vpop.xlane.xlu0 %746 }
 0x332   : > { %v899_v5 = vadd.f32 %v867_v28, %v750_v57  ;;  %v900_v19 = vadd.f32 %v868_v44, %v750_v57  ;;  %v897_v23 = vadd.f32 %v865_v1, %v747_v2  ;;  %v898_v20 = vadd.f32 %v866_v40, %v747_v2 }
 0x334   : > { %931 = vst [vmem:[%s2315_s23 + $0x90] sm:$0xff] %v899_v5  ;;  %932 = vst [vmem:[%s2315_s23 + $0x98] sm:$0xff] %v900_v19 }
 0x335   : > { %929 = vst [vmem:[%s2315_s23 + $0x80] sm:$0xff] %v897_v23  ;;  %930 = vst [vmem:[%s2315_s23 + $0x88] sm:$0xff] %v898_v20  ;;  %v756_v11 = vpop.xlane.xlu1 %755  ;;  %v753_v4 = vpop.xlane.xlu0 %752 }
 0x336   : > { %v903_v61 = vadd.f32 %v871_v6, %v756_v11  ;;  %v904_v42 = vadd.f32 %v872_v49, %v756_v11  ;;  %v901_v0 = vadd.f32 %v869_v36, %v753_v4  ;;  %v902_v17 = vadd.f32 %v870_v12, %v753_v4 }
 0x338   : > { %935 = vst [vmem:[%s2315_s23 + $0xb0] sm:$0xff] %v903_v61  ;;  %936 = vst [vmem:[%s2315_s23 + $0xb8] sm:$0xff] %v904_v42 }
 0x339   : > { %933 = vst [vmem:[%s2315_s23 + $0xa0] sm:$0xff] %v901_v0  ;;  %934 = vst [vmem:[%s2315_s23 + $0xa8] sm:$0xff] %v902_v17  ;;  %v762_v50 = vpop.xlane.xlu1 %761  ;;  %v759_v9 = vpop.xlane.xlu0 %758 }
 0x33a   : > { %v907_v8 = vadd.f32 %v875_v14, %v762_v50  ;;  %v908_v59 = vadd.f32 %v876_v26, %v762_v50  ;;  %v905_v56 = vadd.f32 %v873_v34, %v759_v9  ;;  %v906_v24 = vadd.f32 %v874_v32, %v759_v9 }
 0x33c   : > { %939 = vst [vmem:[%s2315_s23 + $0xd0] sm:$0xff] %v907_v8  ;;  %940 = vst [vmem:[%s2315_s23 + $0xd8] sm:$0xff] %v908_v59 }
 0x33d   : > { %937 = vst [vmem:[%s2315_s23 + $0xc0] sm:$0xff] %v905_v56  ;;  %938 = vst [vmem:[%s2315_s23 + $0xc8] sm:$0xff] %v906_v24  ;;  %v768_v13 = vpop.xlane.xlu1 %767  ;;  %v765_v27 = vpop.xlane.xlu0 %764 }
 0x33e   : > { %v911_v22 = vadd.f32 %v879_v41, %v768_v13  ;;  %v912_v15 = vadd.f32 %v880_v18, %v768_v13  ;;  %v909_v37 = vadd.f32 %v877_v48, %v765_v27  ;;  %v910_v31 = vadd.f32 %v878_v33, %v765_v27 }
 0x340   : > { %943 = vst [vmem:[%s2315_s23 + $0xf0] sm:$0xff] %v911_v22  ;;  %944 = vst [vmem:[%s2315_s23 + $0xf8] sm:$0xff] %v912_v15 }
 0x341   : > { %941 = vst [vmem:[%s2315_s23 + $0xe0] sm:$0xff] %v909_v37  ;;  %942 = vst [vmem:[%s2315_s23 + $0xe8] sm:$0xff] %v910_v31 }
 0x342   : > { %1238 = shalt.err (!%p1235_p2)
}
 0x343   : > { %s1239_s26 = scalar_lea.hbm %s2390_s7, 4096  ;;  %s1243_s29 = scalar_lea.hbm %s2443_s3, 8192 }
 0x344   : > { %p1240_p4 = scmp.ne.s32.totalorder %s2390_s7, %s1239_s26  ;;  %p1244_p9 = scmp.lt.u32.totalorder %s2390_s7, %s2443_s3 }
 0x345   : > { %p1245_p1 = scmp.lt.u32.totalorder %s1243_s29, %s1239_s26  ;;  %p1247_p6 = scmp.lt.u32.totalorder %s1239_s26, %s2390_s7 }
 0x346   : > { %p1241_p5 = pnand %p1240_p4, %p2546_p11 }
 0x347   : > { %p1246_p3 = por %p1245_p1, %p1244_p9 }
 0x348   : > { %p1242_p7 = pneg %p1241_p5 }
 0x349   : > { %p1248_p12 = por %p1247_p6, %p1246_p3 }
 0x34b   : > { %p1249_p13 = pnand %p1248_p12, %p1242_p7 }
 0x34d   : > { %1252 = shalt.err (!%p1249_p13)
}
 0x34e   : > { %s1297_s11 = smov 256   ;;  %s1298_s23 = smov 16  }
 0x34f   : > { %1055 = dma.vmem_to_hbm [thread:$0]  (%p2546_p11), %s2392_s4, 4096, %s2390_s7, %s946_s8, %s1297_s11, %s1297_s11, %s1298_s23  }
 0x350 PF: > { %s975_s9 = sand.u32 1, %s1279_s12   ;;  %p2547_p8 = scmp.ne.s32.totalorder %s2480_s25, 0 }
 0x351   : > { %p2548_p10 = scmp.ge.s32.totalorder %s1291_s15, 2  ;;  %s976_s16 = scalar_lea.sflag [#allocation4], %s975_s9 }
 0x353   : > { %p1062_p0 = pnand %p2548_p10, %p2547_p8 }
 0x355   : > { %1274 = dma.done.wait (!%p1062_p0), %s976_s16, 4096  }
 0x356   : > { %1276 = vsyncadd (!%p1062_p0), %s976_s16, 4294963200  ;;  %p16_p2 = scmp.ge.s32.totalorder %s1344_s18, 4   ;;  %s2549_s12 = smov %s1283_s13 }
 0x357   : > { %s2550_s13 = smov %s1287_s14  ;;  %s2551_s14 = smov %s1356_s21 }
 0x358   : > { %s2552_s15 = smov %s1344_s18  ;;  %18 = sbr.rel (!%p16_p2) target bundleno = 5 (0x5), region = 77 }
 0x35f   :  { %981 = vsyncpa [#allocation3], 1 }
 0x360   :  { %983 = vsyncpa [#allocation3 + $0x1], 1 }
 0x361   :  { %984 = vsyncpa [#allocation4], 1 }
 0x362   :  { %986 = vsyncpa [#allocation4 + $0x1], 1 }

</bundles_post_ra>
